<compile_context>
chip_gen: v6e
topology: v6e:2x2x1
jax: 0.10.0
libtpu: 0.0.40
codegen_flags: <defaults>
</compile_context>

<pallas_src>
import functools

import jax
import jax.numpy as jnp
from jax.experimental import pallas as pl
from jax.experimental.pallas import tpu as pltpu

F32 = jnp.float32
BF16 = jnp.bfloat16
RMS_EPS = float(jnp.finfo(jnp.float32).eps)   # torch.nn.RMSNorm(eps=None) behavior
VMEM_LIMIT = 64 * 1024 * 1024                  # raise scoped VMEM (16/32 MiB defaults)
MOE_ROW_TILE = 8                               # token-row tile for the grouped MoE GEMM


def _rms(v, w, eps):
    ms = jnp.mean(v * v, axis=-1, keepdims=True)
    return v * jax.lax.rsqrt(ms + eps) * w


# ------------------------------ embed kernel --------------------------------

def _embed_kernel(x_ref, w_ref, b_ref, o_ref):
    x = x_ref[...].astype(BF16)
    o_ref[...] = (jnp.dot(x, w_ref[...], preferred_element_type=F32)
                  + b_ref[...]).astype(o_ref.dtype)


def embed(x2, w, b):
    """x2: (M, in) f32, w: (in, D) bf16 (pre-transposed), b: (1, D) f32."""
    M = x2.shape[0]
    D = w.shape[1]
    return pl.pallas_call(
        _embed_kernel,
        out_shape=jax.ShapeDtypeStruct((M, D), F32),
        compiler_params=pltpu.CompilerParams(vmem_limit_bytes=VMEM_LIMIT),
    )(x2, w, b)


# --------------- kernel A: attention + norms + gate + shared MLP ------------

def _attn_block_kernel(x_ref, attn_nw_ref, wqa_ref, bqa_ref, qnw_ref,
                       wqb_ref, bqb_ref, wkva_ref, bkva_ref, kvnw_ref,
                       wk_ref, wv_ref, wo_ref, bo_ref, ffn_nw_ref, gate_w_ref,
                       sw1_ref, sb1_ref, sw3_ref, sb3_ref, sw2_ref, sb2_ref,
                       base_ref, x2n_ref, scores_ref, *, scale, eps):
    s = x_ref.shape[1]
    n_heads, d_h, _ = wk_ref.shape
    dv = wv_ref.shape[2]

    x2 = x_ref[0].astype(F32)                                   # (s, D)
    xn_b = _rms(x2, attn_nw_ref[...], eps).astype(BF16)

    # Low-rank q / kv projections — one wide matmul each (heads stacked in wq_b).
    qa = jnp.dot(xn_b, wqa_ref[...], preferred_element_type=F32) + bqa_ref[...]
    qa = _rms(qa, qnw_ref[...], eps).astype(BF16)               # (s, q_lora)
    q = jnp.dot(qa, wqb_ref[...], preferred_element_type=F32) + bqb_ref[...]   # (s, h*d)
    q3 = jnp.transpose(q.reshape(s, n_heads, d_h), (1, 0, 2)).astype(BF16)     # (h, s, d)

    kv = jnp.dot(xn_b, wkva_ref[...], preferred_element_type=F32) + bkva_ref[...]
    kvn = _rms(kv, kvnw_ref[...], eps)                          # (s, c) == kv_cache[:, :end]
    kvn_b = kvn.astype(BF16)

    # Absorbed-latent queries: single batched matmul over heads.
    q_lat = jnp.einsum('hsd,hdc->hsc', q3, wk_ref[...],
                       preferred_element_type=F32)              # (h, s, c)

    # Causal mask built in-kernel (start_pos = 0).
    row = jax.lax.broadcasted_iota(jnp.int32, (s, s), 0)
    col = jax.lax.broadcasted_iota(jnp.int32, (s, s), 1)
    mask = jnp.where(col > row, -1e30, 0.0).astype(F32)

    att = jnp.einsum('hsc,tc->hst', q_lat.astype(BF16), kvn_b,
                     preferred_element_type=F32) * scale + mask[None]
    m = jnp.max(att, axis=-1, keepdims=True)
    ex = jnp.exp(att - m)
    p = ex * pl.reciprocal(jnp.sum(ex, axis=-1, keepdims=True), approx=True)

    ctx = jnp.einsum('hst,tc->hsc', p.astype(BF16), kvn_b,
                     preferred_element_type=F32)                # (h, s, c)
    out_h = jnp.einsum('hsc,hcv->hsv', ctx.astype(BF16), wv_ref[...],
                       preferred_element_type=F32)              # (h, s, dv)
    out_cat = jnp.concatenate([out_h[i] for i in range(n_heads)],
                              axis=-1).astype(BF16)             # (s, h*dv)
    o = jnp.dot(out_cat, wo_ref[...], preferred_element_type=F32)   # fused wo matmul

    x1 = x2 + o + bo_ref[...]                                   # attention residual

    # ffn norm, routing logits (bf16 x bf16 -> f32 accum), shared-expert MLP.
    x2n = _rms(x1, ffn_nw_ref[...], eps)
    x2n_b = x2n.astype(BF16)
    scores_ref[0] = jnp.dot(x2n_b, gate_w_ref[...], preferred_element_type=F32)

    # TODO(synk): at production D/si the shared-expert weights should move to the MoE
    # pipeline (or get their own K-tiled grid axis) to bound kernel-A VMEM on v7x.
    h1 = jnp.dot(x2n_b, sw1_ref[...], preferred_element_type=F32) + sb1_ref[...]
    h3 = jnp.dot(x2n_b, sw3_ref[...], preferred_element_type=F32) + sb3_ref[...]
    hid = (jax.nn.silu(h1) * h3).astype(BF16)
    z = jnp.dot(hid, sw2_ref[...], preferred_element_type=F32) + sb2_ref[...]

    base_ref[0] = (x1 + z).astype(base_ref.dtype)               # x1 + shared_experts(x2n)
    x2n_ref[0] = x2n.astype(x2n_ref.dtype)


_ATTN_WEIGHT_NAMES = ["attn_norm_w", "wq_a", "bq_a", "q_norm_w", "wq_b", "bq_b",
                      "wkv_a", "bkv_a", "kv_norm_w", "wk", "wv", "wo", "bo",
                      "ffn_norm_w", "gate_w", "sh_w1", "sh_b1", "sh_w3", "sh_b3",
                      "sh_w2", "sh_b2"]


def attn_block(x, lp, cfg):
    b, s, D = x.shape
    E = cfg["n_routed_experts"]

    def _full(arr):
        nd = arr.ndim
        return pl.BlockSpec(arr.shape, lambda i, _nd=nd: (0,) * _nd)

    in_specs = [pl.BlockSpec((1, s, D), lambda i: (i, 0, 0))]
    in_specs += [_full(lp[n]) for n in _ATTN_WEIGHT_NAMES]

    return pl.pallas_call(
        functools.partial(_attn_block_kernel,
                          scale=cfg["qk_nope_head_dim"] ** -0.5, eps=RMS_EPS),
        out_shape=(jax.ShapeDtypeStruct((b, s, D), F32),    # base = x + attn + shared
                   jax.ShapeDtypeStruct((b, s, D), F32),    # ffn_norm(x + attn)
                   jax.ShapeDtypeStruct((b, s, E), F32)),   # gate logits
        grid_spec=pltpu.PrefetchScalarGridSpec(
            num_scalar_prefetch=0,
            grid=(b,),
            in_specs=in_specs,
            out_specs=[pl.BlockSpec((1, s, D), lambda i: (i, 0, 0)),
                       pl.BlockSpec((1, s, D), lambda i: (i, 0, 0)),
                       pl.BlockSpec((1, s, E), lambda i: (i, 0, 0))],
        ),
        compiler_params=pltpu.CompilerParams(
            dimension_semantics=("parallel",),
            vmem_limit_bytes=VMEM_LIMIT),
    )(x, *[lp[n] for n in _ATTN_WEIGHT_NAMES])


# --------------------- kernel B: grouped-GEMM routed MoE ---------------------

def _moe_kernel(tile_e_ref, x_ref, w1_ref, b1_ref, w3_ref, b3_ref, w2_ref, b2_ref,
                o_ref):
    del tile_e_ref                                   # only used by the index_maps
    x = x_ref[...].astype(BF16)                      # (tm, D) token tile of one expert
    h1 = jnp.dot(x, w1_ref[0], preferred_element_type=F32) + b1_ref[0]
    h3 = jnp.dot(x, w3_ref[0], preferred_element_type=F32) + b3_ref[0]
    hid = (jax.nn.silu(h1) * h3).astype(BF16)
    o_ref[...] = jnp.dot(hid, w2_ref[0], preferred_element_type=F32) + b2_ref[0]


def routed_experts(x2n, scores, lp, cfg):
    """Gathered-token grouped GEMM: sort assignments by expert, pad each expert's
    tokens to row-tile multiples, run one grid step per token tile with the expert
    picked via scalar prefetch, then scatter-add gated outputs back to tokens."""
    M, D = x2n.shape
    E = cfg["n_routed_experts"]
    topk = cfg["n_activated_experts"]
    I = cfg["moe_inter_dim"]
    tm = MOE_ROW_TILE

    # --- gate (softmax scoring + top-k), same math as the torch Gate ---------
    probs = jax.nn.softmax(scores.astype(F32), axis=-1)
    weights, indices = jax.lax.top_k(probs, topk)
    weights = weights * cfg["route_scale"]

    # --- routing glue (tiny XLA ops): sorted, per-expert tile-padded dispatch -
    # TODO(synk): top-k / argsort / gather-scatter routing has no clean Pallas
    # equivalent at this scale; kept as small XLA ops (mirrors the torch routing).
    A = M * topk
    flat_e = indices.reshape(A).astype(jnp.int32)
    flat_t = jnp.repeat(jnp.arange(M, dtype=jnp.int32), topk)
    flat_g = weights.reshape(A)

    order = jnp.argsort(flat_e)
    se, st, sg = flat_e[order], flat_t[order], flat_g[order]

    counts = jnp.zeros((E,), jnp.int32).at[flat_e].add(1)
    offs = jnp.cumsum(counts) - counts
    padded = ((counts + tm - 1) // tm) * tm
    pcs = jnp.cumsum(padded)
    poffs = pcs - padded
    dest = poffs[se] + (jnp.arange(A, dtype=jnp.int32) - offs[se])

    P = A + min(E, A) * (tm - 1)                     # static worst-case padded rows
    P = ((P + tm - 1) // tm) * tm
    G = P // tm

    x_disp = jnp.zeros((P, D), F32).at[dest].set(x2n[st])
    gate_disp = jnp.zeros((P, 1), F32).at[dest].set(sg[:, None])
    tok_disp = jnp.zeros((P,), jnp.int32).at[dest].set(st)

    tile_start = jnp.arange(G, dtype=jnp.int32) * tm
    tile_expert = jnp.minimum(
        jnp.searchsorted(pcs, tile_start, side='right'), E - 1).astype(jnp.int32)

    out_disp = pl.pallas_call(
        _moe_kernel,
        out_shape=jax.ShapeDtypeStruct((P, D), F32),
        grid_spec=pltpu.PrefetchScalarGridSpec(
            num_scalar_prefetch=1,
            grid=(G,),
            in_specs=[
                pl.BlockSpec((tm, D), lambda t, te: (t, 0)),          # token tile
                pl.BlockSpec((1, D, I), lambda t, te: (te[t], 0, 0)),  # w1[e]
                pl.BlockSpec((1, 1, I), lambda t, te: (te[t], 0, 0)),  # b1[e]
                pl.BlockSpec((1, D, I), lambda t, te: (te[t], 0, 0)),  # w3[e]
                pl.BlockSpec((1, 1, I), lambda t, te: (te[t], 0, 0)),  # b3[e]
                pl.BlockSpec((1, I, D), lambda t, te: (te[t], 0, 0)),  # w2[e]
                pl.BlockSpec((1, 1, D), lambda t, te: (te[t], 0, 0)),  # b2[e]
            ],
            out_specs=pl.BlockSpec((tm, D), lambda t, te: (t, 0)),
        ),
        compiler_params=pltpu.CompilerParams(
            dimension_semantics=("parallel",),
            vmem_limit_bytes=VMEM_LIMIT),
    )(tile_expert, x_disp,
      lp["exp_w1"], lp["exp_b1"], lp["exp_w3"], lp["exp_b3"],
      lp["exp_w2"], lp["exp_b2"])

    # Un-permute: padding rows carry gate 0, so they contribute nothing.
    y = jnp.zeros((M, D), F32).at[tok_disp].add(out_disp * gate_disp)
    return y


# ------------------------------ model glue ----------------------------------

def block_forward(x, lp, cfg):
    b, s, D = x.shape
    M = b * s
    base, x2n, scores = attn_block(x, lp, cfg)
    y = routed_experts(x2n.reshape(M, D), scores.reshape(M, -1), lp, cfg)
    return (base.reshape(M, D) + y).reshape(b, s, D)


def transformer_forward(tokens, params, cfg):
    b, s, _ = tokens.shape
    D = cfg["dim"]
    h = embed(tokens.reshape(b * s, -1), params["embed_w"], params["embed_b"])
    h = h.reshape(b, s, D)
    for lp in params["layers"]:
        h = block_forward(h, lp, cfg)
    return h


# ------------------------------ parameters ----------------------------------

def init_params(key, cfg):
    """Torch-layout (out, in) random weights; distinct per layer."""
    D = cfg["dim"]
    h = cfg["n_heads"]
    d = cfg["qk_nope_head_dim"]
    dv = cfg["v_head_dim"]
    c = cfg["kv_lora_rank"]
    qlr = cfg["q_lora_rank"]
    E = cfg["n_routed_experts"]
    mi = cfg["moe_inter_dim"]
    si = cfg["n_shared_experts"] * mi

    def layer_params(k):
        keys = iter(jax.random.split(k, 40))

        def nrm(shape, scale=0.05):
            return scale * jax.random.normal(next(keys), shape, dtype=F32)

        return dict(
            attn_norm_w=jnp.ones((D,), F32), ffn_norm_w=jnp.ones((D,), F32),
            wq_a_w=nrm((qlr, D)), wq_a_b=nrm((qlr,)),
            q_norm_w=jnp.ones((qlr,), F32),
            wq_b_w=nrm((h * d, qlr)), wq_b_b=nrm((h * d,)),
            wkv_a_w=nrm((c, D)), wkv_a_b=nrm((c,)),
            kv_norm_w=jnp.ones((c,), F32),
            wkv_b_w=nrm((h * (d + dv), c)),      # wkv_b bias unused on the absorb path
            wo_w=nrm((D, h * dv)), wo_b=nrm((D,)),
            gate_w=nrm((E, D)),
            exp_w1=nrm((E, mi, D)), exp_b1=nrm((E, mi)),
            exp_w2=nrm((E, D, mi)), exp_b2=nrm((E, D)),
            exp_w3=nrm((E, mi, D)), exp_b3=nrm((E, mi)),
            sh_w1=nrm((si, D)), sh_b1=nrm((si,)),
            sh_w2=nrm((D, si)), sh_b2=nrm((D,)),
            sh_w3=nrm((si, D)), sh_b3=nrm((si,)),
        )

    keys = jax.random.split(key, cfg["n_layers"] + 1)
    ek = iter(jax.random.split(keys[0], 4))
    return dict(
        embed_w=0.05 * jax.random.normal(next(ek), (D, cfg["input_dim"]), dtype=F32),
        embed_b=0.05 * jax.random.normal(next(ek), (D,), dtype=F32),
        layers=[layer_params(keys[i + 1]) for i in range(cfg["n_layers"])],
    )


def prepare_params(raw, cfg):
    """One-time transform: pre-transpose / head-stack weights, cast matrices to bf16."""
    D = cfg["dim"]
    h = cfg["n_heads"]
    d = cfg["qk_nope_head_dim"]
    dv = cfg["v_head_dim"]
    c = cfg["kv_lora_rank"]
    qlr = cfg["q_lora_rank"]
    E = cfg["n_routed_experts"]
    mi = cfg["moe_inter_dim"]

    layers = []
    for lp in raw["layers"]:
        wkv_b = lp["wkv_b_w"].reshape(h, d + dv, c)
        layers.append(dict(
            attn_norm_w=lp["attn_norm_w"].reshape(1, D),
            ffn_norm_w=lp["ffn_norm_w"].reshape(1, D),
            wq_a=lp["wq_a_w"].T.astype(BF16), bq_a=lp["wq_a_b"].reshape(1, qlr),
            q_norm_w=lp["q_norm_w"].reshape(1, qlr),
            wq_b=lp["wq_b_w"].T.astype(BF16),               # (qlr, h*d) head-major cols
            bq_b=lp["wq_b_b"].reshape(1, h * d),
            wkv_a=lp["wkv_a_w"].T.astype(BF16), bkv_a=lp["wkv_a_b"].reshape(1, c),
            kv_norm_w=lp["kv_norm_w"].reshape(1, c),
            wk=wkv_b[:, :d, :].astype(BF16),                               # (h, d, c)
            wv=jnp.transpose(wkv_b[:, d:, :], (0, 2, 1)).astype(BF16),     # (h, c, dv)
            wo=lp["wo_w"].T.astype(BF16),                                  # (h*dv, D)
            bo=lp["wo_b"].reshape(1, D),
            gate_w=lp["gate_w"].T.astype(BF16),                            # (D, E)
            sh_w1=lp["sh_w1"].T.astype(BF16), sh_b1=lp["sh_b1"].reshape(1, -1),
            sh_w3=lp["sh_w3"].T.astype(BF16), sh_b3=lp["sh_b3"].reshape(1, -1),
            sh_w2=lp["sh_w2"].T.astype(BF16), sh_b2=lp["sh_b2"].reshape(1, D),
            exp_w1=jnp.transpose(lp["exp_w1"], (0, 2, 1)).astype(BF16),    # (E, D, mi)
            exp_b1=lp["exp_b1"].reshape(E, 1, mi),
            exp_w3=jnp.transpose(lp["exp_w3"], (0, 2, 1)).astype(BF16),
            exp_b3=lp["exp_b3"].reshape(E, 1, mi),
            exp_w2=jnp.transpose(lp["exp_w2"], (0, 2, 1)).astype(BF16),    # (E, mi, D)
            exp_b2=lp["exp_b2"].reshape(E, 1, D),
        ))
    return dict(
        embed_w=raw["embed_w"].T.astype(BF16),
        embed_b=raw["embed_b"].reshape(1, D),
        layers=layers,
    )


# --------------------------------- main --------------------------------------

if __name__ == "__main__":
    # Tile-aligned toy dims (last dim multiples of 128) so vregs/MXU are not padding.
    cfg = dict(
        dim=128, n_layers=1, n_heads=2, input_dim=8,
        q_lora_rank=128, kv_lora_rank=128, qk_nope_head_dim=128, v_head_dim=128,
        n_routed_experts=8, n_shared_experts=2, n_activated_experts=2,
        moe_inter_dim=128, route_scale=1.0,
    )
    key = jax.random.PRNGKey(0)
    kp, kx = jax.random.split(key)
    params = prepare_params(init_params(kp, cfg), cfg)

    bsz, seqlen = 2, 8
    tokens = jax.random.normal(kx, (bsz, seqlen, cfg["input_dim"]), dtype=F32)

    fwd = jax.jit(functools.partial(transformer_forward, cfg=cfg))
    out = jax.block_until_ready(fwd(tokens, params))

    assert out.shape == (bsz, seqlen, cfg["dim"])
    assert bool(jnp.all(jnp.isfinite(out)))
    print("KERNEL_OK")
</pallas_src>

<mosaic_0001>
module attributes {stable_mosaic.version = 11 : i64} {
  func.func private @main(%arg0: i32) attributes {dimension_semantics = [#tpu.dimension_semantics<core_parallel>], iteration_bounds = array<i64: 2>, tpu.core_type = #tpu.core_type<sc_scalar_subcore>, window_params = []} {
    return
  }
}

module attributes {stable_mosaic.version = 11 : i64} {
  func.func private @main(%arg0: i32) attributes {dimension_semantics = [#tpu.dimension_semantics<core_parallel>], iteration_bounds = array<i64: 2>, tpu.core_type = #tpu.core_type<sc_scalar_subcore>, window_params = []} {
    return
  }
}

module attributes {stable_mosaic.version = 11 : i64} {
  func.func @_attn_block_kernel(%arg0: i32, %arg1: memref<1x8x128xf32, #tpu.memory_space<vmem>>, %arg2: memref<1x128xf32, #tpu.memory_space<vmem>>, %arg3: memref<128x128xbf16, #tpu.memory_space<vmem>>, %arg4: memref<1x128xf32, #tpu.memory_space<vmem>>, %arg5: memref<1x128xf32, #tpu.memory_space<vmem>>, %arg6: memref<128x256xbf16, #tpu.memory_space<vmem>>, %arg7: memref<1x256xf32, #tpu.memory_space<vmem>>, %arg8: memref<128x128xbf16, #tpu.memory_space<vmem>>, %arg9: memref<1x128xf32, #tpu.memory_space<vmem>>, %arg10: memref<1x128xf32, #tpu.memory_space<vmem>>, %arg11: memref<2x128x128xbf16, #tpu.memory_space<vmem>>, %arg12: memref<2x128x128xbf16, #tpu.memory_space<vmem>>, %arg13: memref<256x128xbf16, #tpu.memory_space<vmem>>, %arg14: memref<1x128xf32, #tpu.memory_space<vmem>>, %arg15: memref<1x128xf32, #tpu.memory_space<vmem>>, %arg16: memref<128x8xbf16, #tpu.memory_space<vmem>>, %arg17: memref<128x256xbf16, #tpu.memory_space<vmem>>, %arg18: memref<1x256xf32, #tpu.memory_space<vmem>>, %arg19: memref<128x256xbf16, #tpu.memory_space<vmem>>, %arg20: memref<1x256xf32, #tpu.memory_space<vmem>>, %arg21: memref<256x128xbf16, #tpu.memory_space<vmem>>, %arg22: memref<1x128xf32, #tpu.memory_space<vmem>>, %arg23: memref<1x8x128xf32, #tpu.memory_space<vmem>>, %arg24: memref<1x8x128xf32, #tpu.memory_space<vmem>>, %arg25: memref<1x8x8xf32, #tpu.memory_space<vmem>>) attributes {dimension_semantics = [#tpu.dimension_semantics<parallel>], iteration_bounds = array<i64: 2>, scalar_prefetch = 0 : i64, scratch_operands = 0 : i64, tpu.core_type = #tpu.core_type<tc>, window_params = [{transform_indices = @transform_0, window_bounds = array<i64: 1, 8, 128>}, {pipeline_mode = #tpu.pipeline_mode<synchronous>, transform_indices = @transform_1, window_bounds = array<i64: 1, 128>}, {pipeline_mode = #tpu.pipeline_mode<synchronous>, transform_indices = @transform_2, window_bounds = array<i64: 128, 128>}, {pipeline_mode = #tpu.pipeline_mode<synchronous>, transform_indices = @transform_3, window_bounds = array<i64: 1, 128>}, {pipeline_mode = #tpu.pipeline_mode<synchronous>, transform_indices = @transform_4, window_bounds = array<i64: 1, 128>}, {pipeline_mode = #tpu.pipeline_mode<synchronous>, transform_indices = @transform_5, window_bounds = array<i64: 128, 256>}, {pipeline_mode = #tpu.pipeline_mode<synchronous>, transform_indices = @transform_6, window_bounds = array<i64: 1, 256>}, {pipeline_mode = #tpu.pipeline_mode<synchronous>, transform_indices = @transform_7, window_bounds = array<i64: 128, 128>}, {pipeline_mode = #tpu.pipeline_mode<synchronous>, transform_indices = @transform_8, window_bounds = array<i64: 1, 128>}, {pipeline_mode = #tpu.pipeline_mode<synchronous>, transform_indices = @transform_9, window_bounds = array<i64: 1, 128>}, {pipeline_mode = #tpu.pipeline_mode<synchronous>, transform_indices = @transform_10, window_bounds = array<i64: 2, 128, 128>}, {pipeline_mode = #tpu.pipeline_mode<synchronous>, transform_indices = @transform_11, window_bounds = array<i64: 2, 128, 128>}, {pipeline_mode = #tpu.pipeline_mode<synchronous>, transform_indices = @transform_12, window_bounds = array<i64: 256, 128>}, {pipeline_mode = #tpu.pipeline_mode<synchronous>, transform_indices = @transform_13, window_bounds = array<i64: 1, 128>}, {pipeline_mode = #tpu.pipeline_mode<synchronous>, transform_indices = @transform_14, window_bounds = array<i64: 1, 128>}, {pipeline_mode = #tpu.pipeline_mode<synchronous>, transform_indices = @transform_15, window_bounds = array<i64: 128, 8>}, {pipeline_mode = #tpu.pipeline_mode<synchronous>, transform_indices = @transform_16, window_bounds = array<i64: 128, 256>}, {pipeline_mode = #tpu.pipeline_mode<synchronous>, transform_indices = @transform_17, window_bounds = array<i64: 1, 256>}, {pipeline_mode = #tpu.pipeline_mode<synchronous>, transform_indices = @transform_18, window_bounds = array<i64: 128, 256>}, {pipeline_mode = #tpu.pipeline_mode<synchronous>, transform_indices = @transform_19, window_bounds = array<i64: 1, 256>}, {pipeline_mode = #tpu.pipeline_mode<synchronous>, transform_indices = @transform_20, window_bounds = array<i64: 256, 128>}, {pipeline_mode = #tpu.pipeline_mode<synchronous>, transform_indices = @transform_21, window_bounds = array<i64: 1, 128>}, {transform_indices = @transform_22, window_bounds = array<i64: 1, 8, 128>}, {transform_indices = @transform_23, window_bounds = array<i64: 1, 8, 128>}, {transform_indices = @transform_24, window_bounds = array<i64: 1, 8, 8>}]} {
    %c0 = arith.constant 0 : index
    %c0_0 = arith.constant 0 : index
    %c0_1 = arith.constant 0 : index
    %0 = vector.load %arg1[%c0, %c0_0, %c0_1] : memref<1x8x128xf32, #tpu.memory_space<vmem>>, vector<1x8x128xf32>
    %1 = vector.shape_cast %0 : vector<1x8x128xf32> to vector<8x128xf32>
    %c0_2 = arith.constant 0 : index
    %c0_3 = arith.constant 0 : index
    %2 = vector.load %arg2[%c0_2, %c0_3] : memref<1x128xf32, #tpu.memory_space<vmem>>, vector<1x128xf32>
    %3 = arith.mulf %1, %1 : vector<8x128xf32>
    %cst = arith.constant dense<0.000000e+00> : vector<8xf32>
    %4 = vector.multi_reduction <add>, %3, %cst [1] : vector<8x128xf32> to vector<8xf32>
    %5 = vector.shape_cast %4 : vector<8xf32> to vector<8x1xf32>
    %cst_4 = arith.constant 1.280000e+02 : f32
    %6 = vector.broadcast %cst_4 : f32 to vector<8x1xf32>
    %7 = arith.divf %5, %6 : vector<8x1xf32>
    %cst_5 = arith.constant 1.1920929E-7 : f32
    %8 = vector.broadcast %cst_5 : f32 to vector<8x1xf32>
    %9 = arith.addf %7, %8 : vector<8x1xf32>
    %10 = math.rsqrt %9 : vector<8x1xf32>
    %11 = vector.broadcast %10 : vector<8x1xf32> to vector<8x128xf32>
    %12 = arith.mulf %1, %11 : vector<8x128xf32>
    %13 = vector.broadcast %2 : vector<1x128xf32> to vector<8x128xf32>
    %14 = arith.mulf %12, %13 : vector<8x128xf32>
    %15 = arith.truncf %14 : vector<8x128xf32> to vector<8x128xbf16>
    %c0_6 = arith.constant 0 : index
    %c0_7 = arith.constant 0 : index
    %16 = vector.load %arg3[%c0_6, %c0_7] : memref<128x128xbf16, #tpu.memory_space<vmem>>, vector<128x128xbf16>
    %cst_8 = arith.constant dense<0.000000e+00> : vector<8x128xf32>
    %17 = tpu.matmul %15, %16, %cst_8 {dimension_numbers = #tpu.dot_dimension_numbers<[1], [0], [0], [1], [0, 0, 1, 1], [], []>} : vector<8x128xbf16>, vector<128x128xbf16>, vector<8x128xf32> -> vector<8x128xf32>
    %c0_9 = arith.constant 0 : index
    %c0_10 = arith.constant 0 : index
    %18 = vector.load %arg4[%c0_9, %c0_10] : memref<1x128xf32, #tpu.memory_space<vmem>>, vector<1x128xf32>
    %19 = vector.broadcast %18 : vector<1x128xf32> to vector<8x128xf32>
    %20 = arith.addf %17, %19 : vector<8x128xf32>
    %c0_11 = arith.constant 0 : index
    %c0_12 = arith.constant 0 : index
    %21 = vector.load %arg5[%c0_11, %c0_12] : memref<1x128xf32, #tpu.memory_space<vmem>>, vector<1x128xf32>
    %22 = arith.mulf %20, %20 : vector<8x128xf32>
    %cst_13 = arith.constant dense<0.000000e+00> : vector<8xf32>
    %23 = vector.multi_reduction <add>, %22, %cst_13 [1] : vector<8x128xf32> to vector<8xf32>
    %24 = vector.shape_cast %23 : vector<8xf32> to vector<8x1xf32>
    %cst_14 = arith.constant 1.280000e+02 : f32
    %25 = vector.broadcast %cst_14 : f32 to vector<8x1xf32>
    %26 = arith.divf %24, %25 : vector<8x1xf32>
    %cst_15 = arith.constant 1.1920929E-7 : f32
    %27 = vector.broadcast %cst_15 : f32 to vector<8x1xf32>
    %28 = arith.addf %26, %27 : vector<8x1xf32>
    %29 = math.rsqrt %28 : vector<8x1xf32>
    %30 = vector.broadcast %29 : vector<8x1xf32> to vector<8x128xf32>
    %31 = arith.mulf %20, %30 : vector<8x128xf32>
    %32 = vector.broadcast %21 : vector<1x128xf32> to vector<8x128xf32>
    %33 = arith.mulf %31, %32 : vector<8x128xf32>
    %34 = arith.truncf %33 : vector<8x128xf32> to vector<8x128xbf16>
    %c0_16 = arith.constant 0 : index
    %c0_17 = arith.constant 0 : index
    %35 = vector.load %arg6[%c0_16, %c0_17] : memref<128x256xbf16, #tpu.memory_space<vmem>>, vector<128x256xbf16>
    %cst_18 = arith.constant dense<0.000000e+00> : vector<8x256xf32>
    %36 = tpu.matmul %34, %35, %cst_18 {dimension_numbers = #tpu.dot_dimension_numbers<[1], [0], [0], [1], [0, 0, 1, 1], [], []>} : vector<8x128xbf16>, vector<128x256xbf16>, vector<8x256xf32> -> vector<8x256xf32>
    %c0_19 = arith.constant 0 : index
    %c0_20 = arith.constant 0 : index
    %37 = vector.load %arg7[%c0_19, %c0_20] : memref<1x256xf32, #tpu.memory_space<vmem>>, vector<1x256xf32>
    %38 = vector.broadcast %37 : vector<1x256xf32> to vector<8x256xf32>
    %39 = arith.addf %36, %38 : vector<8x256xf32>
    %40 = vector.shape_cast %39 : vector<8x256xf32> to vector<8x2x128xf32>
    %41 = tpu.transpose %40, [1, 0, 2] : vector<8x2x128xf32> -> vector<2x8x128xf32>
    %42 = arith.truncf %41 : vector<2x8x128xf32> to vector<2x8x128xbf16>
    %c0_21 = arith.constant 0 : index
    %c0_22 = arith.constant 0 : index
    %43 = vector.load %arg8[%c0_21, %c0_22] : memref<128x128xbf16, #tpu.memory_space<vmem>>, vector<128x128xbf16>
    %cst_23 = arith.constant dense<0.000000e+00> : vector<8x128xf32>
    %44 = tpu.matmul %15, %43, %cst_23 {dimension_numbers = #tpu.dot_dimension_numbers<[1], [0], [0], [1], [0, 0, 1, 1], [], []>} : vector<8x128xbf16>, vector<128x128xbf16>, vector<8x128xf32> -> vector<8x128xf32>
    %c0_24 = arith.constant 0 : index
    %c0_25 = arith.constant 0 : index
    %45 = vector.load %arg9[%c0_24, %c0_25] : memref<1x128xf32, #tpu.memory_space<vmem>>, vector<1x128xf32>
    %46 = vector.broadcast %45 : vector<1x128xf32> to vector<8x128xf32>
    %47 = arith.addf %44, %46 : vector<8x128xf32>
    %c0_26 = arith.constant 0 : index
    %c0_27 = arith.constant 0 : index
    %48 = vector.load %arg10[%c0_26, %c0_27] : memref<1x128xf32, #tpu.memory_space<vmem>>, vector<1x128xf32>
    %49 = arith.mulf %47, %47 : vector<8x128xf32>
    %cst_28 = arith.constant dense<0.000000e+00> : vector<8xf32>
    %50 = vector.multi_reduction <add>, %49, %cst_28 [1] : vector<8x128xf32> to vector<8xf32>
    %51 = vector.shape_cast %50 : vector<8xf32> to vector<8x1xf32>
    %cst_29 = arith.constant 1.280000e+02 : f32
    %52 = vector.broadcast %cst_29 : f32 to vector<8x1xf32>
    %53 = arith.divf %51, %52 : vector<8x1xf32>
    %cst_30 = arith.constant 1.1920929E-7 : f32
    %54 = vector.broadcast %cst_30 : f32 to vector<8x1xf32>
    %55 = arith.addf %53, %54 : vector<8x1xf32>
    %56 = math.rsqrt %55 : vector<8x1xf32>
    %57 = vector.broadcast %56 : vector<8x1xf32> to vector<8x128xf32>
    %58 = arith.mulf %47, %57 : vector<8x128xf32>
    %59 = vector.broadcast %48 : vector<1x128xf32> to vector<8x128xf32>
    %60 = arith.mulf %58, %59 : vector<8x128xf32>
    %61 = arith.truncf %60 : vector<8x128xf32> to vector<8x128xbf16>
    %c0_31 = arith.constant 0 : index
    %c0_32 = arith.constant 0 : index
    %c0_33 = arith.constant 0 : index
    %62 = vector.load %arg11[%c0_31, %c0_32, %c0_33] : memref<2x128x128xbf16, #tpu.memory_space<vmem>>, vector<2x128x128xbf16>
    "tpu.trace_start"() <{level = 10 : i32, message = "hsd,hdc->hsc"}> : () -> ()
    %cst_34 = arith.constant dense<0.000000e+00> : vector<2x8x128xf32>
    %63 = tpu.matmul %42, %62, %cst_34 {dimension_numbers = #tpu.dot_dimension_numbers<[2], [1], [1], [2], [0, 0, 0, 1, 1, 2], [0], [0]>} : vector<2x8x128xbf16>, vector<2x128x128xbf16>, vector<2x8x128xf32> -> vector<2x8x128xf32>
    "tpu.trace_stop"() : () -> ()
    %64 = tpu.iota {dimensions = array<i32: 0>} : vector<8x8xi32>
    %65 = tpu.iota {dimensions = array<i32: 1>} : vector<8x8xi32>
    %66 = arith.cmpi sgt, %65, %64 : vector<8x8xi32>
    %cst_35 = arith.constant -1.000000e+30 : f32
    %cst_36 = arith.constant 0.000000e+00 : f32
    %67 = vector.broadcast %cst_35 : f32 to vector<8x8xf32>
    %68 = vector.broadcast %cst_36 : f32 to vector<8x8xf32>
    %69 = arith.select %66, %67, %68 : vector<8x8xi1>, vector<8x8xf32>
    %70 = arith.truncf %63 : vector<2x8x128xf32> to vector<2x8x128xbf16>
    "tpu.trace_start"() <{level = 10 : i32, message = "hsc,tc->hst"}> : () -> ()
    %cst_37 = arith.constant dense<0.000000e+00> : vector<2x8x8xf32>
    %71 = tpu.matmul %70, %61, %cst_37 {dimension_numbers = #tpu.dot_dimension_numbers<[2], [1], [0, 1], [0], [0, 0, 0, 1, 1, 0], [], []>} : vector<2x8x128xbf16>, vector<8x128xbf16>, vector<2x8x8xf32> -> vector<2x8x8xf32>
    "tpu.trace_stop"() : () -> ()
    %cst_38 = arith.constant 0.0883883461 : f32
    %72 = vector.broadcast %cst_38 : f32 to vector<2x8x8xf32>
    %73 = arith.mulf %71, %72 : vector<2x8x8xf32>
    %74 = vector.shape_cast %69 : vector<8x8xf32> to vector<1x8x8xf32>
    %75 = vector.broadcast %74 : vector<1x8x8xf32> to vector<2x8x8xf32>
    %76 = arith.addf %73, %75 : vector<2x8x8xf32>
    %cst_39 = arith.constant dense<0xFF800000> : vector<2x8xf32>
    %77 = vector.multi_reduction <maximumf>, %76, %cst_39 [2] : vector<2x8x8xf32> to vector<2x8xf32>
    %78 = vector.shape_cast %77 : vector<2x8xf32> to vector<2x8x1xf32>
    %79 = vector.broadcast %78 : vector<2x8x1xf32> to vector<2x8x8xf32>
    %80 = arith.subf %76, %79 : vector<2x8x8xf32>
    %81 = math.exp %80 : vector<2x8x8xf32>
    %cst_40 = arith.constant dense<0.000000e+00> : vector<2x8xf32>
    %82 = vector.multi_reduction <add>, %81, %cst_40 [2] : vector<2x8x8xf32> to vector<2x8xf32>
    %83 = vector.shape_cast %82 : vector<2x8xf32> to vector<2x8x1xf32>
    %84 = tpu.reciprocal %83 {approx = true} : vector<2x8x1xf32> -> vector<2x8x1xf32>
    %85 = vector.broadcast %84 : vector<2x8x1xf32> to vector<2x8x8xf32>
    %86 = arith.mulf %81, %85 : vector<2x8x8xf32>
    %87 = arith.truncf %86 : vector<2x8x8xf32> to vector<2x8x8xbf16>
    "tpu.trace_start"() <{level = 10 : i32, message = "hst,tc->hsc"}> : () -> ()
    %cst_41 = arith.constant dense<0.000000e+00> : vector<2x8x128xf32>
    %88 = tpu.matmul %87, %61, %cst_41 {dimension_numbers = #tpu.dot_dimension_numbers<[2], [0], [0, 1], [1], [0, 0, 0, 1, 1, 1], [], []>} : vector<2x8x8xbf16>, vector<8x128xbf16>, vector<2x8x128xf32> -> vector<2x8x128xf32>
    "tpu.trace_stop"() : () -> ()
    %89 = arith.truncf %88 : vector<2x8x128xf32> to vector<2x8x128xbf16>
    %c0_42 = arith.constant 0 : index
    %c0_43 = arith.constant 0 : index
    %c0_44 = arith.constant 0 : index
    %90 = vector.load %arg12[%c0_42, %c0_43, %c0_44] : memref<2x128x128xbf16, #tpu.memory_space<vmem>>, vector<2x128x128xbf16>
    "tpu.trace_start"() <{level = 10 : i32, message = "hsc,hcv->hsv"}> : () -> ()
    %cst_45 = arith.constant dense<0.000000e+00> : vector<2x8x128xf32>
    %91 = tpu.matmul %89, %90, %cst_45 {dimension_numbers = #tpu.dot_dimension_numbers<[2], [1], [1], [2], [0, 0, 0, 1, 1, 2], [0], [0]>} : vector<2x8x128xbf16>, vector<2x128x128xbf16>, vector<2x8x128xf32> -> vector<2x8x128xf32>
    "tpu.trace_stop"() : () -> ()
    %92 = vector.extract_strided_slice %91 {offsets = [0, 0, 0], sizes = [1, 8, 128], strides = [1, 1, 1]} : vector<2x8x128xf32> to vector<1x8x128xf32>
    %93 = vector.shape_cast %92 : vector<1x8x128xf32> to vector<8x128xf32>
    %94 = vector.extract_strided_slice %91 {offsets = [1, 0, 0], sizes = [1, 8, 128], strides = [1, 1, 1]} : vector<2x8x128xf32> to vector<1x8x128xf32>
    %95 = vector.shape_cast %94 : vector<1x8x128xf32> to vector<8x128xf32>
    %96 = tpu.concatenate %93, %95 in 1 : vector<8x128xf32>, vector<8x128xf32> -> vector<8x256xf32>
    %97 = arith.truncf %96 : vector<8x256xf32> to vector<8x256xbf16>
    %c0_46 = arith.constant 0 : index
    %c0_47 = arith.constant 0 : index
    %98 = vector.load %arg13[%c0_46, %c0_47] : memref<256x128xbf16, #tpu.memory_space<vmem>>, vector<256x128xbf16>
    %cst_48 = arith.constant dense<0.000000e+00> : vector<8x128xf32>
    %99 = tpu.matmul %97, %98, %cst_48 {dimension_numbers = #tpu.dot_dimension_numbers<[1], [0], [0], [1], [0, 0, 1, 1], [], []>} : vector<8x256xbf16>, vector<256x128xbf16>, vector<8x128xf32> -> vector<8x128xf32>
    %100 = arith.addf %1, %99 : vector<8x128xf32>
    %c0_49 = arith.constant 0 : index
    %c0_50 = arith.constant 0 : index
    %101 = vector.load %arg14[%c0_49, %c0_50] : memref<1x128xf32, #tpu.memory_space<vmem>>, vector<1x128xf32>
    %102 = vector.broadcast %101 : vector<1x128xf32> to vector<8x128xf32>
    %103 = arith.addf %100, %102 : vector<8x128xf32>
    %c0_51 = arith.constant 0 : index
    %c0_52 = arith.constant 0 : index
    %104 = vector.load %arg15[%c0_51, %c0_52] : memref<1x128xf32, #tpu.memory_space<vmem>>, vector<1x128xf32>
    %105 = arith.mulf %103, %103 : vector<8x128xf32>
    %cst_53 = arith.constant dense<0.000000e+00> : vector<8xf32>
    %106 = vector.multi_reduction <add>, %105, %cst_53 [1] : vector<8x128xf32> to vector<8xf32>
    %107 = vector.shape_cast %106 : vector<8xf32> to vector<8x1xf32>
    %cst_54 = arith.constant 1.280000e+02 : f32
    %108 = vector.broadcast %cst_54 : f32 to vector<8x1xf32>
    %109 = arith.divf %107, %108 : vector<8x1xf32>
    %cst_55 = arith.constant 1.1920929E-7 : f32
    %110 = vector.broadcast %cst_55 : f32 to vector<8x1xf32>
    %111 = arith.addf %109, %110 : vector<8x1xf32>
    %112 = math.rsqrt %111 : vector<8x1xf32>
    %113 = vector.broadcast %112 : vector<8x1xf32> to vector<8x128xf32>
    %114 = arith.mulf %103, %113 : vector<8x128xf32>
    %115 = vector.broadcast %104 : vector<1x128xf32> to vector<8x128xf32>
    %116 = arith.mulf %114, %115 : vector<8x128xf32>
    %117 = arith.truncf %116 : vector<8x128xf32> to vector<8x128xbf16>
    %c0_56 = arith.constant 0 : index
    %c0_57 = arith.constant 0 : index
    %118 = vector.load %arg16[%c0_56, %c0_57] : memref<128x8xbf16, #tpu.memory_space<vmem>>, vector<128x8xbf16>
    %cst_58 = arith.constant dense<0.000000e+00> : vector<8x8xf32>
    %119 = tpu.matmul %117, %118, %cst_58 {dimension_numbers = #tpu.dot_dimension_numbers<[1], [0], [0], [1], [0, 0, 1, 1], [], []>} : vector<8x128xbf16>, vector<128x8xbf16>, vector<8x8xf32> -> vector<8x8xf32>
    %c0_59 = arith.constant 0 : index
    %c0_60 = arith.constant 0 : index
    %c0_61 = arith.constant 0 : index
    %120 = vector.load %arg25[%c0_59, %c0_60, %c0_61] : memref<1x8x8xf32, #tpu.memory_space<vmem>>, vector<1x8x8xf32>
    %121 = vector.shape_cast %120 : vector<1x8x8xf32> to vector<8x8xf32>
    %122 = vector.shape_cast %119 : vector<8x8xf32> to vector<1x8x8xf32>
    tpu.vector_store %arg25[%c0_59, %c0_60, %c0_61], %122 {strides = array<i32>} : memref<1x8x8xf32, #tpu.memory_space<vmem>>, vector<1x8x8xf32>,
    %c0_62 = arith.constant 0 : index
    %c0_63 = arith.constant 0 : index
    %123 = vector.load %arg17[%c0_62, %c0_63] : memref<128x256xbf16, #tpu.memory_space<vmem>>, vector<128x256xbf16>
    %cst_64 = arith.constant dense<0.000000e+00> : vector<8x256xf32>
    %124 = tpu.matmul %117, %123, %cst_64 {dimension_numbers = #tpu.dot_dimension_numbers<[1], [0], [0], [1], [0, 0, 1, 1], [], []>} : vector<8x128xbf16>, vector<128x256xbf16>, vector<8x256xf32> -> vector<8x256xf32>
    %c0_65 = arith.constant 0 : index
    %c0_66 = arith.constant 0 : index
    %125 = vector.load %arg18[%c0_65, %c0_66] : memref<1x256xf32, #tpu.memory_space<vmem>>, vector<1x256xf32>
    %126 = vector.broadcast %125 : vector<1x256xf32> to vector<8x256xf32>
    %127 = arith.addf %124, %126 : vector<8x256xf32>
    %c0_67 = arith.constant 0 : index
    %c0_68 = arith.constant 0 : index
    %128 = vector.load %arg19[%c0_67, %c0_68] : memref<128x256xbf16, #tpu.memory_space<vmem>>, vector<128x256xbf16>
    %cst_69 = arith.constant dense<0.000000e+00> : vector<8x256xf32>
    %129 = tpu.matmul %117, %128, %cst_69 {dimension_numbers = #tpu.dot_dimension_numbers<[1], [0], [0], [1], [0, 0, 1, 1], [], []>} : vector<8x128xbf16>, vector<128x256xbf16>, vector<8x256xf32> -> vector<8x256xf32>
    %c0_70 = arith.constant 0 : index
    %c0_71 = arith.constant 0 : index
    %130 = vector.load %arg20[%c0_70, %c0_71] : memref<1x256xf32, #tpu.memory_space<vmem>>, vector<1x256xf32>
    %131 = vector.broadcast %130 : vector<1x256xf32> to vector<8x256xf32>
    %132 = arith.addf %129, %131 : vector<8x256xf32>
    %133 = arith.negf %127 : vector<8x256xf32>
    %134 = math.exp %133 : vector<8x256xf32>
    %cst_72 = arith.constant 1.000000e+00 : f32
    %135 = vector.broadcast %cst_72 : f32 to vector<8x256xf32>
    %136 = arith.addf %135, %134 : vector<8x256xf32>
    %137 = arith.divf %135, %136 : vector<8x256xf32>
    %138 = arith.mulf %127, %137 : vector<8x256xf32>
    %139 = arith.mulf %138, %132 : vector<8x256xf32>
    %140 = arith.truncf %139 : vector<8x256xf32> to vector<8x256xbf16>
    %c0_73 = arith.constant 0 : index
    %c0_74 = arith.constant 0 : index
    %141 = vector.load %arg21[%c0_73, %c0_74] : memref<256x128xbf16, #tpu.memory_space<vmem>>, vector<256x128xbf16>
    %cst_75 = arith.constant dense<0.000000e+00> : vector<8x128xf32>
    %142 = tpu.matmul %140, %141, %cst_75 {dimension_numbers = #tpu.dot_dimension_numbers<[1], [0], [0], [1], [0, 0, 1, 1], [], []>} : vector<8x256xbf16>, vector<256x128xbf16>, vector<8x128xf32> -> vector<8x128xf32>
    %c0_76 = arith.constant 0 : index
    %c0_77 = arith.constant 0 : index
    %143 = vector.load %arg22[%c0_76, %c0_77] : memref<1x128xf32, #tpu.memory_space<vmem>>, vector<1x128xf32>
    %144 = vector.broadcast %143 : vector<1x128xf32> to vector<8x128xf32>
    %145 = arith.addf %142, %144 : vector<8x128xf32>
    %146 = arith.addf %103, %145 : vector<8x128xf32>
    %c0_78 = arith.constant 0 : index
    %c0_79 = arith.constant 0 : index
    %c0_80 = arith.constant 0 : index
    %147 = vector.load %arg23[%c0_78, %c0_79, %c0_80] : memref<1x8x128xf32, #tpu.memory_space<vmem>>, vector<1x8x128xf32>
    %148 = vector.shape_cast %147 : vector<1x8x128xf32> to vector<8x128xf32>
    %149 = vector.shape_cast %146 : vector<8x128xf32> to vector<1x8x128xf32>
    tpu.vector_store %arg23[%c0_78, %c0_79, %c0_80], %149 {strides = array<i32>} : memref<1x8x128xf32, #tpu.memory_space<vmem>>, vector<1x8x128xf32>,
    %c0_81 = arith.constant 0 : index
    %c0_82 = arith.constant 0 : index
    %c0_83 = arith.constant 0 : index
    %150 = vector.load %arg24[%c0_81, %c0_82, %c0_83] : memref<1x8x128xf32, #tpu.memory_space<vmem>>, vector<1x8x128xf32>
    %151 = vector.shape_cast %150 : vector<1x8x128xf32> to vector<8x128xf32>
    %152 = vector.shape_cast %116 : vector<8x128xf32> to vector<1x8x128xf32>
    tpu.vector_store %arg24[%c0_81, %c0_82, %c0_83], %152 {strides = array<i32>} : memref<1x8x128xf32, #tpu.memory_space<vmem>>, vector<1x8x128xf32>,
    return
  }
  func.func @transform_0(%arg0: i32) -> (i32, i32, i32) {
    %c0_i32 = arith.constant 0 : i32
    %c0_i32_0 = arith.constant 0 : i32
    %c0_i32_1 = arith.constant 0 : i32
    return %arg0, %c0_i32, %c0_i32_0 : i32, i32, i32
  }
  func.func @transform_1(%arg0: i32) -> (i32, i32) {
    %c0_i32 = arith.constant 0 : i32
    %c0_i32_0 = arith.constant 0 : i32
    %c0_i32_1 = arith.constant 0 : i32
    return %c0_i32, %c0_i32_0 : i32, i32
  }
  func.func @transform_2(%arg0: i32) -> (i32, i32) {
    %c0_i32 = arith.constant 0 : i32
    %c0_i32_0 = arith.constant 0 : i32
    %c0_i32_1 = arith.constant 0 : i32
    return %c0_i32, %c0_i32_0 : i32, i32
  }
  func.func @transform_3(%arg0: i32) -> (i32, i32) {
    %c0_i32 = arith.constant 0 : i32
    %c0_i32_0 = arith.constant 0 : i32
    %c0_i32_1 = arith.constant 0 : i32
    return %c0_i32, %c0_i32_0 : i32, i32
  }
  func.func @transform_4(%arg0: i32) -> (i32, i32) {
    %c0_i32 = arith.constant 0 : i32
    %c0_i32_0 = arith.constant 0 : i32
    %c0_i32_1 = arith.constant 0 : i32
    return %c0_i32, %c0_i32_0 : i32, i32
  }
  func.func @transform_5(%arg0: i32) -> (i32, i32) {
    %c0_i32 = arith.constant 0 : i32
    %c0_i32_0 = arith.constant 0 : i32
    %c0_i32_1 = arith.constant 0 : i32
    return %c0_i32, %c0_i32_0 : i32, i32
  }
  func.func @transform_6(%arg0: i32) -> (i32, i32) {
    %c0_i32 = arith.constant 0 : i32
    %c0_i32_0 = arith.constant 0 : i32
    %c0_i32_1 = arith.constant 0 : i32
    return %c0_i32, %c0_i32_0 : i32, i32
  }
  func.func @transform_7(%arg0: i32) -> (i32, i32) {
    %c0_i32 = arith.constant 0 : i32
    %c0_i32_0 = arith.constant 0 : i32
    %c0_i32_1 = arith.constant 0 : i32
    return %c0_i32, %c0_i32_0 : i32, i32
  }
  func.func @transform_8(%arg0: i32) -> (i32, i32) {
    %c0_i32 = arith.constant 0 : i32
    %c0_i32_0 = arith.constant 0 : i32
    %c0_i32_1 = arith.constant 0 : i32
    return %c0_i32, %c0_i32_0 : i32, i32
  }
  func.func @transform_9(%arg0: i32) -> (i32, i32) {
    %c0_i32 = arith.constant 0 : i32
    %c0_i32_0 = arith.constant 0 : i32
    %c0_i32_1 = arith.constant 0 : i32
    return %c0_i32, %c0_i32_0 : i32, i32
  }
  func.func @transform_10(%arg0: i32) -> (i32, i32, i32) {
    %c0_i32 = arith.constant 0 : i32
    %c0_i32_0 = arith.constant 0 : i32
    %c0_i32_1 = arith.constant 0 : i32
    %c0_i32_2 = arith.constant 0 : i32
    return %c0_i32, %c0_i32_0, %c0_i32_1 : i32, i32, i32
  }
  func.func @transform_11(%arg0: i32) -> (i32, i32, i32) {
    %c0_i32 = arith.constant 0 : i32
    %c0_i32_0 = arith.constant 0 : i32
    %c0_i32_1 = arith.constant 0 : i32
    %c0_i32_2 = arith.constant 0 : i32
    return %c0_i32, %c0_i32_0, %c0_i32_1 : i32, i32, i32
  }
  func.func @transform_12(%arg0: i32) -> (i32, i32) {
    %c0_i32 = arith.constant 0 : i32
    %c0_i32_0 = arith.constant 0 : i32
    %c0_i32_1 = arith.constant 0 : i32
    return %c0_i32, %c0_i32_0 : i32, i32
  }
  func.func @transform_13(%arg0: i32) -> (i32, i32) {
    %c0_i32 = arith.constant 0 : i32
    %c0_i32_0 = arith.constant 0 : i32
    %c0_i32_1 = arith.constant 0 : i32
    return %c0_i32, %c0_i32_0 : i32, i32
  }
  func.func @transform_14(%arg0: i32) -> (i32, i32) {
    %c0_i32 = arith.constant 0 : i32
    %c0_i32_0 = arith.constant 0 : i32
    %c0_i32_1 = arith.constant 0 : i32
    return %c0_i32, %c0_i32_0 : i32, i32
  }
  func.func @transform_15(%arg0: i32) -> (i32, i32) {
    %c0_i32 = arith.constant 0 : i32
    %c0_i32_0 = arith.constant 0 : i32
    %c0_i32_1 = arith.constant 0 : i32
    return %c0_i32, %c0_i32_0 : i32, i32
  }
  func.func @transform_16(%arg0: i32) -> (i32, i32) {
    %c0_i32 = arith.constant 0 : i32
    %c0_i32_0 = arith.constant 0 : i32
    %c0_i32_1 = arith.constant 0 : i32
    return %c0_i32, %c0_i32_0 : i32, i32
  }
  func.func @transform_17(%arg0: i32) -> (i32, i32) {
    %c0_i32 = arith.constant 0 : i32
    %c0_i32_0 = arith.constant 0 : i32
    %c0_i32_1 = arith.constant 0 : i32
    return %c0_i32, %c0_i32_0 : i32, i32
  }
  func.func @transform_18(%arg0: i32) -> (i32, i32) {
    %c0_i32 = arith.constant 0 : i32
    %c0_i32_0 = arith.constant 0 : i32
    %c0_i32_1 = arith.constant 0 : i32
    return %c0_i32, %c0_i32_0 : i32, i32
  }
  func.func @transform_19(%arg0: i32) -> (i32, i32) {
    %c0_i32 = arith.constant 0 : i32
    %c0_i32_0 = arith.constant 0 : i32
    %c0_i32_1 = arith.constant 0 : i32
    return %c0_i32, %c0_i32_0 : i32, i32
  }
  func.func @transform_20(%arg0: i32) -> (i32, i32) {
    %c0_i32 = arith.constant 0 : i32
    %c0_i32_0 = arith.constant 0 : i32
    %c0_i32_1 = arith.constant 0 : i32
    return %c0_i32, %c0_i32_0 : i32, i32
  }
  func.func @transform_21(%arg0: i32) -> (i32, i32) {
    %c0_i32 = arith.constant 0 : i32
    %c0_i32_0 = arith.constant 0 : i32
    %c0_i32_1 = arith.constant 0 : i32
    return %c0_i32, %c0_i32_0 : i32, i32
  }
  func.func @transform_22(%arg0: i32) -> (i32, i32, i32) {
    %c0_i32 = arith.constant 0 : i32
    %c0_i32_0 = arith.constant 0 : i32
    %c0_i32_1 = arith.constant 0 : i32
    return %arg0, %c0_i32, %c0_i32_0 : i32, i32, i32
  }
  func.func @transform_23(%arg0: i32) -> (i32, i32, i32) {
    %c0_i32 = arith.constant 0 : i32
    %c0_i32_0 = arith.constant 0 : i32
    %c0_i32_1 = arith.constant 0 : i32
    return %arg0, %c0_i32, %c0_i32_0 : i32, i32, i32
  }
  func.func @transform_24(%arg0: i32) -> (i32, i32, i32) {
    %c0_i32 = arith.constant 0 : i32
    %c0_i32_0 = arith.constant 0 : i32
    %c0_i32_1 = arith.constant 0 : i32
    return %arg0, %c0_i32, %c0_i32_0 : i32, i32, i32
  }
}

module attributes {stable_mosaic.version = 11 : i64} {
  func.func @_embed_kernel(%arg0: memref<16x8xf32, #tpu.memory_space<vmem>>, %arg1: memref<8x128xbf16, #tpu.memory_space<vmem>>, %arg2: memref<1x128xf32, #tpu.memory_space<vmem>>, %arg3: memref<16x128xf32, #tpu.memory_space<vmem>>) attributes {dimension_semantics = [], scalar_prefetch = 0 : i64, scratch_operands = 0 : i64, tpu.core_type = #tpu.core_type<tc>} {
    %c0 = arith.constant 0 : index
    %c0_0 = arith.constant 0 : index
    %0 = vector.load %arg0[%c0, %c0_0] : memref<16x8xf32, #tpu.memory_space<vmem>>, vector<16x8xf32>
    %1 = arith.truncf %0 : vector<16x8xf32> to vector<16x8xbf16>
    %c0_1 = arith.constant 0 : index
    %c0_2 = arith.constant 0 : index
    %2 = vector.load %arg1[%c0_1, %c0_2] : memref<8x128xbf16, #tpu.memory_space<vmem>>, vector<8x128xbf16>
    %cst = arith.constant dense<0.000000e+00> : vector<16x128xf32>
    %3 = tpu.matmul %1, %2, %cst {dimension_numbers = #tpu.dot_dimension_numbers<[1], [0], [0], [1], [0, 0, 1, 1], [], []>} : vector<16x8xbf16>, vector<8x128xbf16>, vector<16x128xf32> -> vector<16x128xf32>
    %c0_3 = arith.constant 0 : index
    %c0_4 = arith.constant 0 : index
    %4 = vector.load %arg2[%c0_3, %c0_4] : memref<1x128xf32, #tpu.memory_space<vmem>>, vector<1x128xf32>
    %5 = vector.broadcast %4 : vector<1x128xf32> to vector<16x128xf32>
    %6 = arith.addf %3, %5 : vector<16x128xf32>
    %c0_5 = arith.constant 0 : index
    %c0_6 = arith.constant 0 : index
    %7 = vector.load %arg3[%c0_5, %c0_6] : memref<16x128xf32, #tpu.memory_space<vmem>>, vector<16x128xf32>
    tpu.vector_store %arg3[%c0_5, %c0_6], %6 {strides = array<i32>} : memref<16x128xf32, #tpu.memory_space<vmem>>, vector<16x128xf32>,
    return
  }
}

module attributes {stable_mosaic.version = 11 : i64} {
  func.func @_moe_kernel(%arg0: i32, %arg1: memref<11xi32, #tpu.memory_space<smem>>, %arg2: memref<8x128xf32, #tpu.memory_space<vmem>>, %arg3: memref<1x128x128xbf16, #tpu.memory_space<vmem>>, %arg4: memref<1x1x128xf32, #tpu.memory_space<vmem>>, %arg5: memref<1x128x128xbf16, #tpu.memory_space<vmem>>, %arg6: memref<1x1x128xf32, #tpu.memory_space<vmem>>, %arg7: memref<1x128x128xbf16, #tpu.memory_space<vmem>>, %arg8: memref<1x1x128xf32, #tpu.memory_space<vmem>>, %arg9: memref<8x128xf32, #tpu.memory_space<vmem>>) attributes {dimension_semantics = [#tpu.dimension_semantics<parallel>], iteration_bounds = array<i64: 11>, scalar_prefetch = 1 : i64, scratch_operands = 0 : i64, tpu.core_type = #tpu.core_type<tc>, window_params = [{transform_indices = @transform_0, window_bounds = array<i64: 8, 128>}, {transform_indices = @transform_1, window_bounds = array<i64: 1, 128, 128>}, {transform_indices = @transform_2, window_bounds = array<i64: 1, 1, 128>}, {transform_indices = @transform_3, window_bounds = array<i64: 1, 128, 128>}, {transform_indices = @transform_4, window_bounds = array<i64: 1, 1, 128>}, {transform_indices = @transform_5, window_bounds = array<i64: 1, 128, 128>}, {transform_indices = @transform_6, window_bounds = array<i64: 1, 1, 128>}, {transform_indices = @transform_7, window_bounds = array<i64: 8, 128>}]} {
    %c0 = arith.constant 0 : index
    %c0_0 = arith.constant 0 : index
    %0 = vector.load %arg2[%c0, %c0_0] : memref<8x128xf32, #tpu.memory_space<vmem>>, vector<8x128xf32>
    %1 = arith.truncf %0 : vector<8x128xf32> to vector<8x128xbf16>
    %c0_1 = arith.constant 0 : index
    %c0_2 = arith.constant 0 : index
    %c0_3 = arith.constant 0 : index
    %2 = vector.load %arg3[%c0_1, %c0_2, %c0_3] : memref<1x128x128xbf16, #tpu.memory_space<vmem>>, vector<1x128x128xbf16>
    %3 = vector.shape_cast %2 : vector<1x128x128xbf16> to vector<128x128xbf16>
    %cst = arith.constant dense<0.000000e+00> : vector<8x128xf32>
    %4 = tpu.matmul %1, %3, %cst {dimension_numbers = #tpu.dot_dimension_numbers<[1], [0], [0], [1], [0, 0, 1, 1], [], []>} : vector<8x128xbf16>, vector<128x128xbf16>, vector<8x128xf32> -> vector<8x128xf32>
    %c0_4 = arith.constant 0 : index
    %c0_5 = arith.constant 0 : index
    %c0_6 = arith.constant 0 : index
    %5 = vector.load %arg4[%c0_4, %c0_5, %c0_6] : memref<1x1x128xf32, #tpu.memory_space<vmem>>, vector<1x1x128xf32>
    %6 = vector.shape_cast %5 : vector<1x1x128xf32> to vector<1x128xf32>
    %7 = vector.broadcast %6 : vector<1x128xf32> to vector<8x128xf32>
    %8 = arith.addf %4, %7 : vector<8x128xf32>
    %c0_7 = arith.constant 0 : index
    %c0_8 = arith.constant 0 : index
    %c0_9 = arith.constant 0 : index
    %9 = vector.load %arg5[%c0_7, %c0_8, %c0_9] : memref<1x128x128xbf16, #tpu.memory_space<vmem>>, vector<1x128x128xbf16>
    %10 = vector.shape_cast %9 : vector<1x128x128xbf16> to vector<128x128xbf16>
    %cst_10 = arith.constant dense<0.000000e+00> : vector<8x128xf32>
    %11 = tpu.matmul %1, %10, %cst_10 {dimension_numbers = #tpu.dot_dimension_numbers<[1], [0], [0], [1], [0, 0, 1, 1], [], []>} : vector<8x128xbf16>, vector<128x128xbf16>, vector<8x128xf32> -> vector<8x128xf32>
    %c0_11 = arith.constant 0 : index
    %c0_12 = arith.constant 0 : index
    %c0_13 = arith.constant 0 : index
    %12 = vector.load %arg6[%c0_11, %c0_12, %c0_13] : memref<1x1x128xf32, #tpu.memory_space<vmem>>, vector<1x1x128xf32>
    %13 = vector.shape_cast %12 : vector<1x1x128xf32> to vector<1x128xf32>
    %14 = vector.broadcast %13 : vector<1x128xf32> to vector<8x128xf32>
    %15 = arith.addf %11, %14 : vector<8x128xf32>
    %16 = arith.negf %8 : vector<8x128xf32>
    %17 = math.exp %16 : vector<8x128xf32>
    %cst_14 = arith.constant 1.000000e+00 : f32
    %18 = vector.broadcast %cst_14 : f32 to vector<8x128xf32>
    %19 = arith.addf %18, %17 : vector<8x128xf32>
    %20 = arith.divf %18, %19 : vector<8x128xf32>
    %21 = arith.mulf %8, %20 : vector<8x128xf32>
    %22 = arith.mulf %21, %15 : vector<8x128xf32>
    %23 = arith.truncf %22 : vector<8x128xf32> to vector<8x128xbf16>
    %c0_15 = arith.constant 0 : index
    %c0_16 = arith.constant 0 : index
    %c0_17 = arith.constant 0 : index
    %24 = vector.load %arg7[%c0_15, %c0_16, %c0_17] : memref<1x128x128xbf16, #tpu.memory_space<vmem>>, vector<1x128x128xbf16>
    %25 = vector.shape_cast %24 : vector<1x128x128xbf16> to vector<128x128xbf16>
    %cst_18 = arith.constant dense<0.000000e+00> : vector<8x128xf32>
    %26 = tpu.matmul %23, %25, %cst_18 {dimension_numbers = #tpu.dot_dimension_numbers<[1], [0], [0], [1], [0, 0, 1, 1], [], []>} : vector<8x128xbf16>, vector<128x128xbf16>, vector<8x128xf32> -> vector<8x128xf32>
    %c0_19 = arith.constant 0 : index
    %c0_20 = arith.constant 0 : index
    %c0_21 = arith.constant 0 : index
    %27 = vector.load %arg8[%c0_19, %c0_20, %c0_21] : memref<1x1x128xf32, #tpu.memory_space<vmem>>, vector<1x1x128xf32>
    %28 = vector.shape_cast %27 : vector<1x1x128xf32> to vector<1x128xf32>
    %29 = vector.broadcast %28 : vector<1x128xf32> to vector<8x128xf32>
    %30 = arith.addf %26, %29 : vector<8x128xf32>
    %c0_22 = arith.constant 0 : index
    %c0_23 = arith.constant 0 : index
    %31 = vector.load %arg9[%c0_22, %c0_23] : memref<8x128xf32, #tpu.memory_space<vmem>>, vector<8x128xf32>
    tpu.vector_store %arg9[%c0_22, %c0_23], %30 {strides = array<i32>} : memref<8x128xf32, #tpu.memory_space<vmem>>, vector<8x128xf32>,
    return
  }
  func.func @transform_0(%arg0: i32, %arg1: memref<11xi32, #tpu.memory_space<smem>>) -> (i32, i32) {
    %c0_i32 = arith.constant 0 : i32
    %c0_i32_0 = arith.constant 0 : i32
    return %arg0, %c0_i32 : i32, i32
  }
  func.func @transform_1(%arg0: i32, %arg1: memref<11xi32, #tpu.memory_space<smem>>) -> (i32, i32, i32) {
    %0 = arith.index_cast %arg0 : i32 to index
    %1 = memref.load %arg1[%0] : memref<11xi32, #tpu.memory_space<smem>>
    %c0_i32 = arith.constant 0 : i32
    %c0_i32_0 = arith.constant 0 : i32
    %c0_i32_1 = arith.constant 0 : i32
    return %1, %c0_i32, %c0_i32_0 : i32, i32, i32
  }
  func.func @transform_2(%arg0: i32, %arg1: memref<11xi32, #tpu.memory_space<smem>>) -> (i32, i32, i32) {
    %0 = arith.index_cast %arg0 : i32 to index
    %1 = memref.load %arg1[%0] : memref<11xi32, #tpu.memory_space<smem>>
    %c0_i32 = arith.constant 0 : i32
    %c0_i32_0 = arith.constant 0 : i32
    %c0_i32_1 = arith.constant 0 : i32
    return %1, %c0_i32, %c0_i32_0 : i32, i32, i32
  }
  func.func @transform_3(%arg0: i32, %arg1: memref<11xi32, #tpu.memory_space<smem>>) -> (i32, i32, i32) {
    %0 = arith.index_cast %arg0 : i32 to index
    %1 = memref.load %arg1[%0] : memref<11xi32, #tpu.memory_space<smem>>
    %c0_i32 = arith.constant 0 : i32
    %c0_i32_0 = arith.constant 0 : i32
    %c0_i32_1 = arith.constant 0 : i32
    return %1, %c0_i32, %c0_i32_0 : i32, i32, i32
  }
  func.func @transform_4(%arg0: i32, %arg1: memref<11xi32, #tpu.memory_space<smem>>) -> (i32, i32, i32) {
    %0 = arith.index_cast %arg0 : i32 to index
    %1 = memref.load %arg1[%0] : memref<11xi32, #tpu.memory_space<smem>>
    %c0_i32 = arith.constant 0 : i32
    %c0_i32_0 = arith.constant 0 : i32
    %c0_i32_1 = arith.constant 0 : i32
    return %1, %c0_i32, %c0_i32_0 : i32, i32, i32
  }
  func.func @transform_5(%arg0: i32, %arg1: memref<11xi32, #tpu.memory_space<smem>>) -> (i32, i32, i32) {
    %0 = arith.index_cast %arg0 : i32 to index
    %1 = memref.load %arg1[%0] : memref<11xi32, #tpu.memory_space<smem>>
    %c0_i32 = arith.constant 0 : i32
    %c0_i32_0 = arith.constant 0 : i32
    %c0_i32_1 = arith.constant 0 : i32
    return %1, %c0_i32, %c0_i32_0 : i32, i32, i32
  }
  func.func @transform_6(%arg0: i32, %arg1: memref<11xi32, #tpu.memory_space<smem>>) -> (i32, i32, i32) {
    %0 = arith.index_cast %arg0 : i32 to index
    %1 = memref.load %arg1[%0] : memref<11xi32, #tpu.memory_space<smem>>
    %c0_i32 = arith.constant 0 : i32
    %c0_i32_0 = arith.constant 0 : i32
    %c0_i32_1 = arith.constant 0 : i32
    return %1, %c0_i32, %c0_i32_0 : i32, i32, i32
  }
  func.func @transform_7(%arg0: i32, %arg1: memref<11xi32, #tpu.memory_space<smem>>) -> (i32, i32) {
    %c0_i32 = arith.constant 0 : i32
    %c0_i32_0 = arith.constant 0 : i32
    return %arg0, %c0_i32 : i32, i32
  }
}

</mosaic_0001>

<bundles_post_ra>
// kernel: custom-call.1
= control target key start
LH: loop header
LB: loop body
LE: loop exit
PB: predicated region body
PF: predicated region fallthrough
CT: control target
= control target key end

     0   :  { %s6_s0 = inlined_call_operand.vmem [shape: u32[11], index: 0, kind: output, shape index: {}]  }

// kernel: sub.13
= control target key start
LH: loop header
LB: loop body
LE: loop exit
PB: predicated region body
PF: predicated region fallthrough
CT: control target
= control target key end

     0   :  { %vm8_vm0 = vcmask 64512   ;;  %vm14_vm1 = vcmask 130112   ;;  %s42_s0 = inlined_call_operand.vmem [shape: f32[2,8], index: 0, kind: input, shape index: {}]   ;;  %s43_s1 = inlined_call_operand.vmem [shape: f32[16], index: 1, kind: output, shape index: {}]  }
   0x1   :  { %v5_v0 = vld [vmem:[%s42_s0] sm:$0x3]  ;;  %s25_s0 = smov 8  }
   0x2   :  { %6 = vst [vmem:[#allocation1] sm:$0x3] %v5_v0 }
   0x9   :  { %v11_v1 = vld [vmem:[#allocation1 + $0x1] sm:$0x1]   ;;  %v7_v2 = vld [vmem:[#allocation1] sm:$0x1]  }
   0xa   :  { %12 = vrot.lane.b32.xlu0 %v11_v1, %s25_s0  ;;  %9 = vst.msk [vmem:[#allocation0] sm:$0x1] %vm8_vm0, %v7_v2  }
  0x7c   :  { %v13_v3 = vpop.permute.xlu0 %12  }
  0x7d   :  { %15 = vst.msk [vmem:[#allocation0] sm:$0x1] %vm14_vm1, %v13_v3  }
  0x84   :  { %v20_v4 = vld [vmem:[#allocation0] sm:$0x1] }
  0x85   :  { %23 = vst [vmem:[%s43_s1] sm:$0x1] %v20_v4 }

// kernel: transformer_forward.3
= control target key start
LH: loop header
LB: loop body
LE: loop exit
PB: predicated region body
PF: predicated region fallthrough
CT: control target
= control target key end

     0   :  { %vm30_vm0 = vcmask 1043456   ;;  %v93_v0 = vmov 0.0   ;;  %vm94_vm1 = vmmov 0   ;;  %vm26_vm2 = vcmask 64512   ;;  %s133_s1 = inlined_call_operand.vmem [shape: bf16[8,128], index: 1, kind: input, shape index: {}]   ;;  %s134_s0 = inlined_call_operand.vmem [shape: f32[16,8], index: 0, kind: input, shape index: {}]   ;;  %s135_s2 = inlined_call_operand.vmem [shape: f32[1,128], index: 2, kind: input, shape index: {}]   ;;  %s136_s3 = inlined_call_operand.vmem [shape: f32[16,128], index: 3, kind: output, shape index: {}]  }
   0x1   :  { %85 = vmatprep.subr.bf16.mxu0 %v93_v0  ;;  %v18_v1 = vld [vmem:[%s133_s1] sm:$0xf]  ;;  %87 = vmatprep.mubr.msk.bf16.mxu0 %vm94_vm1, %v93_v0  ;;  %v16_v3 = vld [vmem:[%s134_s0 + $0x8] sm:$0xff] }
   0x2   :  { %v15_v2 = vld [vmem:[%s134_s0] sm:$0xff]  ;;  %v32_v4 = vsel %vm30_vm0, %v18_v1, 0 }
   0x3   :  { %v17_v5 = vpack.c.bf16 %v16_v3, %v15_v2  ;;  %86 = vmatpush3.bf16.msra.mxu0 %v32_v4  ;;  %v81_v6 = vld [vmem:[%s135_s2] ss:$0 sm:$0xff] }
   0x6   :  { %88 = vmatmul.mubr.msk.bf16.vlgmr.msra.gmra.mxu0 %vm26_vm2, %v17_v5 }
  0xc6   :  { %v68_v7 = vpop.f32.mrf.mxu0 }
  0xc7   :  { %v69_v8 = vadd.f32 %v81_v6, %v68_v7 }
  0xc8   :  { %v89_v9 = vpop.f32.mrf.mxu0 }
  0xc9   :  { %75 = vst [vmem:[%s136_s3] sm:$0xff] %v69_v8 }
  0xca   :  { %v71_v10 = vpop.f32.mrf.mxu0 }
  0xcb   :  { %v72_v11 = vadd.f32 %v81_v6, %v71_v10 }
  0xcc   :  { %v90_v12 = vpop.f32.mrf.mxu0 }
  0xcd   :  { %76 = vst [vmem:[%s136_s3 + $0x8] sm:$0xff] %v72_v11 }

// kernel: transformer_forward.4
= control target key start
LH: loop header
LB: loop body
LE: loop exit
PB: predicated region body
PF: predicated region fallthrough
CT: control target
= control target key end

     0   :  { %s4870_s0 = inlined_call_operand.vmem [shape: f32[2,8,128], index: 0, kind: input, shape index: {}]   ;;  %s4871_s1 = inlined_call_operand.vmem [shape: f32[1,128], index: 1, kind: input, shape index: {}]   ;;  %s4872_s2 = inlined_call_operand.hbm [shape: bf16[128,128], index: 2, kind: input, shape index: {}]   ;;  %s4873_s3 = inlined_call_operand.vmem [shape: f32[1,128], index: 3, kind: input, shape index: {}]   ;;  %s4874_s4 = inlined_call_operand.hbm [shape: f32[1,128], index: 4, kind: input, shape index: {}]   ;;  %s4875_s5 = inlined_call_operand.hbm [shape: bf16[128,256], index: 5, kind: input, shape index: {}]   ;;  %s4876_s6 = inlined_call_operand.vmem [shape: f32[1,256], index: 6, kind: input, shape index: {}]   ;;  %s4877_s7 = inlined_call_operand.hbm [shape: bf16[128,128], index: 7, kind: input, shape index: {}]   ;;  %s4878_s8 = inlined_call_operand.vmem [shape: f32[1,128], index: 8, kind: input, shape index: {}]   ;;  %s4879_s9 = inlined_call_operand.hbm [shape: f32[1,128], index: 9, kind: input, shape index: {}]   ;;  %s4880_s10 = inlined_call_operand.hbm [shape: bf16[2,128,128], index: 10, kind: input, shape index: {}]   ;;  %s4881_s11 = inlined_call_operand.hbm [shape: bf16[2,128,128], index: 11, kind: input, shape index: {}]   ;;  %s4882_s12 = inlined_call_operand.hbm [shape: bf16[256,128], index: 12, kind: input, shape index: {}]   ;;  %s4883_s13 = inlined_call_operand.vmem [shape: f32[1,128], index: 13, kind: input, shape index: {}]   ;;  %s4884_s14 = inlined_call_operand.hbm [shape: f32[1,128], index: 14, kind: input, shape index: {}]   ;;  %s4885_s15 = inlined_call_operand.vmem [shape: bf16[128,8], index: 15, kind: input, shape index: {}]   ;;  %s4886_s16 = inlined_call_operand.vmem [shape: bf16[128,256], index: 16, kind: input, shape index: {}]   ;;  %s4887_s17 = inlined_call_operand.hbm [shape: f32[1,256], index: 17, kind: input, shape index: {}]   ;;  %s4888_s18 = inlined_call_operand.hbm [shape: bf16[128,256], index: 18, kind: input, shape index: {}]   ;;  %s4889_s19 = inlined_call_operand.hbm [shape: f32[1,256], index: 19, kind: input, shape index: {}]   ;;  %s4890_s20 = inlined_call_operand.hbm [shape: bf16[256,128], index: 20, kind: input, shape index: {}]   ;;  %s4891_s21 = inlined_call_operand.hbm [shape: f32[1,128], index: 21, kind: input, shape index: {}]   ;;  %s4892_s22 = inlined_call_operand.vmem [shape: f32[2,8,128], index: 22, kind: output, shape index: {0}]   ;;  %s4893_s23 = inlined_call_operand.vmem [shape: f32[2,8,128], index: 23, kind: output, shape index: {1}]   ;;  %s4894_s24 = inlined_call_operand.vmem [shape: f32[2,8,8], index: 24, kind: output, shape index: {2}]  }
   0x1   :  { %4902 = sst [smem:[#allocation32_spill]] %s4870_s0 }
   0x2   :  { %4903 = sst [smem:[#allocation33_spill]] %s4871_s1 }
   0x3   :  { %4904 = sst [smem:[#allocation34_spill]] %s4872_s2 }
   0x4   :  { %4905 = sst [smem:[#allocation35_spill]] %s4873_s3 }
   0x5   :  { %4906 = sst [smem:[#allocation36_spill]] %s4874_s4 }
   0x6   :  { %4907 = sst [smem:[#allocation37_spill]] %s4875_s5 }
   0x7   :  { %4908 = sst [smem:[#allocation38_spill]] %s4876_s6 }
   0x8   :  { %4909 = sst [smem:[#allocation39_spill]] %s4877_s7 }
   0x9   :  { %4910 = sst [smem:[#allocation40_spill]] %s4878_s8 }
   0xa   :  { %4911 = sst [smem:[#allocation41_spill]] %s4879_s9 }
   0xb   :  { %4912 = sst [smem:[#allocation42_spill]] %s4880_s10 }
   0xc   :  { %4913 = sst [smem:[#allocation43_spill]] %s4882_s12 }
   0xd   :  { %30 = vsyncpa [#allocation3], 0 }
   0xe   :  { %31 = vsyncpa [#allocation5], 0 }
   0xf   :  { %32 = vsyncpa [#allocation8], 0 }
  0x10   :  { %33 = vsyncpa [#allocation11], 0 }
  0x11   :  { %34 = vsyncpa [#allocation14], 0 }
  0x12   :  { %35 = vsyncpa [#allocation17], 0 }
  0x13   :  { %36 = vsyncpa [#allocation20], 0 }
  0x14   :  { %37 = vsyncpa [#allocation23], 0  ;;  %s4436_s5 = smov 0  }
  0x15 LB: > { %s4288_s26 = smov [#allocation4]   ;;  %s4442_s28 = sadd.s32 4294967295, %s4286_s5   ;;  %s4286_s5 = sphi %s4436_s5, %s43_s5  }
  0x16   : > { %s625_s27 = sshll.u32 %s4288_s26, 4  ;;  %p3088_p0 = scmp.ge.s32.totalorder %s4286_s5, 1  ;;  %s626_s27 = int_to_ptr.vmem [resolvable:$true] %s625_s27 }
  0x17   : > { %p593_p1 = scmp.lt.s32.totalorder %s4286_s5, 3  ;;  %p4895_p2 = scmp.eq.s32.totalorder %s4442_s28, 0 }
  0x18   : > { %s4289_s2 = smov [#allocation7]   ;;  %s4290_s7 = smov [#allocation10]  }
  0x19   : > { %p4447_p3 = pnand %p3088_p0, %p593_p1  ;;  %s651_s29 = sshll.u32 %s4289_s2, 4  ;;  %s4453_s29 = int_to_ptr.vmem [resolvable:$true] %s651_s29 }
  0x1a   : > { %s678_s30 = sshll.u32 %s4290_s7, 4  ;;  %s4291_s3 = smov [#allocation13]   ;;  %s4461_s30 = int_to_ptr.vmem [resolvable:$true] %s678_s30 }
  0x1b   : > { %s4914_s6 = scalar_select %p4447_p3, 1, 0 }
  0x1c   : > { %p3597_p4 = pneg %p4447_p3  ;;  %s4463_s25 = sshll.u32 %s4291_s3, 4  ;;  %s705_s25 = int_to_ptr.vmem [resolvable:$true] %s4463_s25 }
  0x1d   : > { %s3895_s4 = scalar_lea.vmem %s626_s27, 16  ;;  %s3902_s1 = scalar_lea.vmem %s626_s27, 32 }
  0x1e   : > { %p4457_p5 = pnand %p4895_p2, %p3597_p4  ;;  %p3896_p7 = scmp.ne.s32.totalorder %s626_s27, %s3895_s4 }
  0x1f   : > { %p3903_p10 = scmp.lt.s32.totalorder %s626_s27, %s626_s27  ;;  %p3904_p11 = scmp.lt.s32.totalorder %s3902_s1, %s3895_s4 }
  0x20   : > { %p4467_p6 = pneg %p4457_p5 }
  0x21   : > { %p3905_p12 = por %p3904_p11, %p3903_p10 }
  0x22   : > { %p3898_p8 = pnand %p3896_p7, %p4467_p6 }
  0x24   : > { %p3899_p9 = pneg %p3898_p8 }
  0x26   : > { %p3906_p13 = pnand %p3905_p12, %p3899_p9 }
  0x28   : > { %3909 = shalt.err (!%p3906_p13)
}
  0x29   : > { %s4917_s7 = sld [smem:[#allocation36_spill]]  ;;  %s3921_s3 = scalar_lea.vmem %s4453_s29, 1024 }
  0x2a   : > { %p3922_p0 = scmp.ne.s32.totalorder %s4453_s29, %s3921_s3  ;;  %p3929_p7 = scmp.lt.s32.totalorder %s4453_s29, %s4453_s29 }
  0x2b   : > { %p3930_p8 = scmp.lt.s32.totalorder %s3921_s3, %s3921_s3 }
  0x2c   : > { %p3924_p1 = pnand %p3922_p0, %p4467_p6 }
  0x2d   : > { %p3931_p9 = por %p3930_p8, %p3929_p7 }
  0x2e   : > { %p3925_p4 = pneg %p3924_p1 }
  0x2f   : > { %3603 = dma.hbm_to_vmem [thread:$0]  (!%p4457_p5), %s4917_s7, 16, %s626_s27, [#allocation5]  }
  0x30   : > { %p3932_p10 = pnand %p3931_p9, %p3925_p4 }
  0x32   : > { %3935 = shalt.err (!%p3932_p10)
}
  0x33   : > { %s4897_s4 = smov 64   ;;  %s4899_s1 = smov 4  }
  0x34   : > { %s4918_s2 = sld [smem:[#allocation39_spill]]  ;;  %s3947_s7 = scalar_lea.vmem %s4461_s30, 2048 }
  0x35   : > { %p3948_p11 = scmp.ne.s32.totalorder %s4461_s30, %s3947_s7  ;;  %p3955_p0 = scmp.lt.s32.totalorder %s4461_s30, %s4461_s30 }
  0x36   : > { %p3956_p1 = scmp.lt.s32.totalorder %s3947_s7, %s3947_s7 }
  0x37   : > { %p3950_p12 = pnand %p3948_p11, %p4467_p6 }
  0x38   : > { %p3957_p4 = por %p3956_p1, %p3955_p0 }
  0x39   : > { %p3951_p13 = pneg %p3950_p12 }
  0x3a   : > { %3609 = dma.hbm_to_vmem [thread:$0]  (!%p4457_p5), %s4918_s2, 1024, %s4453_s29, [#allocation8], %s4897_s4, %s4897_s4, %s4899_s1  }
  0x3b   : > { %p3958_p7 = pnand %p3957_p4, %p3951_p13 }
  0x3d   : > { %3961 = shalt.err (!%p3958_p7)
}
  0x3e   : > { %s4919_s10 = sld [smem:[#allocation42_spill]]  ;;  %s3973_s29 = scalar_lea.vmem %s705_s25, 2048 }
  0x3f   : > { %p3974_p8 = scmp.ne.s32.totalorder %s705_s25, %s3973_s29  ;;  %p3981_p11 = scmp.lt.s32.totalorder %s705_s25, %s705_s25 }
  0x40   : > { %p3982_p12 = scmp.lt.s32.totalorder %s3973_s29, %s3973_s29 }
  0x41   : > { %p3976_p9 = pnand %p3974_p8, %p4467_p6 }
  0x42   : > { %p3983_p13 = por %p3982_p12, %p3981_p11 }
  0x43   : > { %p3977_p10 = pneg %p3976_p9 }
  0x44   : > { %3615 = dma.hbm_to_vmem [thread:$0]  (!%p4457_p5), %s4919_s10, 2048, %s4461_s30, [#allocation11], %s4897_s4, %s4897_s4, %s4899_s1  }
  0x45   : > { %p3984_p0 = pnand %p3983_p13, %p3977_p10 }
  0x47   : > { %3987 = shalt.err (!%p3984_p0)
}
  0x48   : > { %s4920_s12 = sld [smem:[#allocation43_spill]]  ;;  %s4294_s30 = smov [#allocation16]  }
  0x49   : > { %s738_s7 = sshll.u32 %s4294_s30, 4  ;;  %s4295_s3 = smov [#allocation19]   ;;  %s739_s7 = int_to_ptr.vmem [resolvable:$true] %s738_s7 }
  0x4a   : > { %s762_s27 = sshll.u32 %s4295_s3, 4  ;;  %s3999_s10 = scalar_lea.vmem %s739_s7, 32  ;;  %s763_s27 = int_to_ptr.vmem [resolvable:$true] %s762_s27 }
  0x4b   : > { %p4000_p1 = scmp.ne.s32.totalorder %s739_s7, %s3999_s10  ;;  %p4007_p8 = scmp.lt.s32.totalorder %s739_s7, %s739_s7 }
  0x4c   : > { %p4008_p9 = scmp.lt.s32.totalorder %s3999_s10, %s3999_s10 }
  0x4d   : > { %p4002_p4 = pnand %p4000_p1, %p4467_p6 }
  0x4e   : > { %3621 = dma.hbm_to_vmem [thread:$0]  (!%p4457_p5), %s4920_s12, 2048, %s705_s25, [#allocation14], %s4897_s4, %s4897_s4, %s4899_s1  }
  0x4f   : > { %p4003_p7 = pneg %p4002_p4  ;;  %p4009_p10 = por %p4008_p9, %p4007_p8 }
  0x51   : > { %p4010_p11 = pnand %p4009_p10, %p4003_p7 }
  0x53   : > { %4013 = shalt.err (!%p4010_p11)
}
  0x54   : > { %3627 = dma.hbm_to_vmem [thread:$0]  (!%p4457_p5), %s4887_s17, 32, %s739_s7, [#allocation17]  }
  0x55   : > { %s4025_s25 = scalar_lea.vmem %s763_s27, 32  ;;  %p4033_p1 = scmp.lt.s32.totalorder %s763_s27, %s763_s27 }
  0x56   : > { %p4026_p12 = scmp.ne.s32.totalorder %s763_s27, %s4025_s25  ;;  %p4034_p4 = scmp.lt.s32.totalorder %s4025_s25, %s4025_s25 }
  0x58   : > { %p4028_p13 = pnand %p4026_p12, %p4467_p6  ;;  %p4035_p2 = por %p4034_p4, %p4033_p1 }
  0x5a   : > { %p4029_p0 = pneg %p4028_p13 }
  0x5c   : > { %p4036_p3 = pnand %p4035_p2, %p4029_p0 }
  0x5e   : > { %4039 = shalt.err (!%p4036_p3)
}
  0x5f   : > { %3633 = dma.hbm_to_vmem [thread:$0]  (!%p4457_p5), %s4889_s19, 32, %s763_s27, [#allocation20]  }
  0x60   : > { %s4296_s30 = smov [#allocation2]   ;;  %s4297_s3 = smov [#allocation6]  }
  0x61   : > { %s608_s7 = sshll.u32 %s4296_s30, 4  ;;  %s635_s29 = sshll.u32 %s4297_s3, 4  ;;  %s609_s7 = int_to_ptr.vmem [resolvable:$true] %s608_s7  ;;  %s636_s29 = int_to_ptr.vmem [resolvable:$true] %s635_s29 }
  0x62   : > { %s4051_s26 = scalar_lea.vmem %s609_s7, 1024  ;;  %p4059_p10 = scmp.lt.s32.totalorder %s609_s7, %s609_s7 }
  0x63   : > { %p4052_p7 = scmp.ne.s32.totalorder %s609_s7, %s4051_s26  ;;  %p4060_p2 = scmp.lt.s32.totalorder %s4051_s26, %s4051_s26 }
  0x65   : > { %p4054_p8 = pnand %p4052_p7, %p4467_p6  ;;  %p4061_p3 = por %p4060_p2, %p4059_p10 }
  0x67   : > { %p4055_p9 = pneg %p4054_p8 }
  0x69   : > { %p4062_p11 = pnand %p4061_p3, %p4055_p9 }
  0x6b   : > { %4065 = shalt.err (!%p4062_p11)
}
  0x6c   : > { %s4921_s10 = sld [smem:[#allocation34_spill]]  ;;  %s4077_s2 = scalar_lea.vmem %s636_s29, 2048 }
  0x6d   : > { %p4078_p12 = scmp.ne.s32.totalorder %s636_s29, %s4077_s2  ;;  %p4085_p1 = scmp.lt.s32.totalorder %s636_s29, %s636_s29 }
  0x6e   : > { %p4086_p4 = scmp.lt.s32.totalorder %s4077_s2, %s4077_s2 }
  0x6f   : > { %p4080_p13 = pnand %p4078_p12, %p4467_p6 }
  0x70   : > { %p4087_p7 = por %p4086_p4, %p4085_p1 }
  0x71   : > { %p4081_p0 = pneg %p4080_p13 }
  0x72   : > { %3600 = dma.hbm_to_vmem [thread:$0]  (!%p4457_p5), %s4921_s10, 1024, %s609_s7, [#allocation3], %s4897_s4, %s4897_s4, %s4899_s1  }
  0x73   : > { %p4088_p8 = pnand %p4087_p7, %p4081_p0 }
  0x75   : > { %4091 = shalt.err (!%p4088_p8)
}
  0x76   : > { %s4901_s30 = smov 128   ;;  %s4299_s3 = smov 8  }
  0x77   : > { %s4922_s27 = sld [smem:[#allocation37_spill]]  ;;  %s4300_s25 = smov [#allocation9]  }
  0x78   : > { %s668_s10 = sshll.u32 %s4300_s25, 4  ;;  %s4301_s4 = smov [#allocation12]   ;;  %s669_s10 = int_to_ptr.vmem [resolvable:$true] %s668_s10 }
  0x79   : > { %s691_s2 = sshll.u32 %s4301_s4, 4  ;;  %s4103_s1 = scalar_lea.vmem %s669_s10, 16  ;;  %s692_s2 = int_to_ptr.vmem [resolvable:$true] %s691_s2 }
  0x7a   : > { %p4104_p9 = scmp.ne.s32.totalorder %s669_s10, %s4103_s1  ;;  %s4110_s12 = scalar_lea.vmem %s669_s10, 32 }
  0x7b   : > { %p4111_p3 = scmp.lt.s32.totalorder %s669_s10, %s669_s10  ;;  %p4112_p11 = scmp.lt.s32.totalorder %s4110_s12, %s4103_s1 }
  0x7c   : > { %p4106_p10 = pnand %p4104_p9, %p4467_p6 }
  0x7d   : > { %3606 = dma.hbm_to_vmem [thread:$0]  (!%p4457_p5), %s4922_s27, 2048, %s636_s29, [#allocation5], %s4901_s30, %s4901_s30, %s4299_s3  }
  0x7e   : > { %p4107_p2 = pneg %p4106_p10  ;;  %p4113_p12 = por %p4112_p11, %p4111_p3 }
  0x80   : > { %p4114_p13 = pnand %p4113_p12, %p4107_p2 }
  0x82   : > { %4117 = shalt.err (!%p4114_p13)
}
  0x83   : > { %s4923_s9 = sld [smem:[#allocation41_spill]]  ;;  %s4129_s4 = scalar_lea.vmem %s692_s2, 2048 }
  0x84   : > { %p4130_p0 = scmp.ne.s32.totalorder %s692_s2, %s4129_s4  ;;  %p4137_p7 = scmp.lt.s32.totalorder %s692_s2, %s692_s2 }
  0x85   : > { %p4138_p8 = scmp.lt.s32.totalorder %s4129_s4, %s4129_s4 }
  0x86   : > { %p4132_p1 = pnand %p4130_p0, %p4467_p6 }
  0x87   : > { %p4139_p9 = por %p4138_p8, %p4137_p7 }
  0x88   : > { %p4133_p4 = pneg %p4132_p1 }
  0x89   : > { %3612 = dma.hbm_to_vmem [thread:$0]  (!%p4457_p5), %s4923_s9, 16, %s669_s10, [#allocation8]  }
  0x8a   : > { %p4140_p10 = pnand %p4139_p9, %p4133_p4 }
  0x8c   : > { %4143 = shalt.err (!%p4140_p10)
}
  0x8d   : > { %s4924_s12 = smov 4   ;;  %s4925_s1 = smov 64  }
  0x8e   : > { %3618 = dma.hbm_to_vmem [thread:$0]  (!%p4457_p5), %s4881_s11, 2048, %s692_s2, [#allocation11], %s4925_s1, %s4925_s1, %s4924_s12  }
  0x8f   : > { %s4302_s25 = smov [#allocation15]   ;;  %s4303_s7 = smov [#allocation18]  }
  0x90   : > { %s721_s10 = sshll.u32 %s4302_s25, 4  ;;  %s748_s29 = sshll.u32 %s4303_s7, 4  ;;  %s722_s10 = int_to_ptr.vmem [resolvable:$true] %s721_s10  ;;  %s749_s29 = int_to_ptr.vmem [resolvable:$true] %s748_s29 }
  0x91   : > { %s4155_s30 = scalar_lea.vmem %s722_s10, 16  ;;  %s4162_s4 = scalar_lea.vmem %s722_s10, 32 }
  0x92   : > { %p4156_p2 = scmp.ne.s32.totalorder %s722_s10, %s4155_s30  ;;  %p4163_p12 = scmp.lt.s32.totalorder %s722_s10, %s722_s10 }
  0x93   : > { %p4164_p13 = scmp.lt.s32.totalorder %s4162_s4, %s4155_s30 }
  0x94   : > { %p4158_p3 = pnand %p4156_p2, %p4467_p6 }
  0x95   : > { %p4165_p0 = por %p4164_p13, %p4163_p12 }
  0x96   : > { %p4159_p11 = pneg %p4158_p3 }
  0x98   : > { %p4166_p1 = pnand %p4165_p0, %p4159_p11 }
  0x9a   : > { %4169 = shalt.err (!%p4166_p1)
}
  0x9b   : > { %3624 = dma.hbm_to_vmem [thread:$0]  (!%p4457_p5), %s4884_s14, 16, %s722_s10, [#allocation14]  }
  0x9c   : > { %s4181_s27 = scalar_lea.vmem %s749_s29, 2048  ;;  %p4189_p9 = scmp.lt.s32.totalorder %s749_s29, %s749_s29 }
  0x9d   : > { %p4182_p4 = scmp.ne.s32.totalorder %s749_s29, %s4181_s27  ;;  %p4190_p10 = scmp.lt.s32.totalorder %s4181_s27, %s4181_s27 }
  0x9f   : > { %p4184_p7 = pnand %p4182_p4, %p4467_p6  ;;  %p4191_p2 = por %p4190_p10, %p4189_p9 }
  0xa1   : > { %p4185_p8 = pneg %p4184_p7 }
  0xa3   : > { %p4192_p3 = pnand %p4191_p2, %p4185_p8 }
  0xa5   : > { %4195 = shalt.err (!%p4192_p3)
}
  0xa6   : > { %s4926_s30 = smov 128   ;;  %s4304_s10 = smov [#allocation21]  }
  0xa7   : > { %3630 = dma.hbm_to_vmem [thread:$0]  (!%p4457_p5), %s4888_s18, 2048, %s749_s29, [#allocation17], %s4926_s30, %s4926_s30, %s4299_s3  }
  0xa8   : > { %s772_s4 = sshll.u32 %s4304_s10, 4  ;;  %s4305_s26 = smov [#allocation22]   ;;  %s773_s4 = int_to_ptr.vmem [resolvable:$true] %s772_s4 }
  0xa9   : > { %s786_s2 = sshll.u32 %s4305_s26, 4  ;;  %s4207_s9 = scalar_lea.vmem %s773_s4, 2048  ;;  %s787_s2 = int_to_ptr.vmem [resolvable:$true] %s786_s2 }
  0xaa   : > { %p4208_p11 = scmp.ne.s32.totalorder %s773_s4, %s4207_s9  ;;  %p4215_p0 = scmp.lt.s32.totalorder %s773_s4, %s773_s4 }
  0xab   : > { %p4216_p1 = scmp.lt.s32.totalorder %s4207_s9, %s4207_s9 }
  0xac   : > { %p4210_p12 = pnand %p4208_p11, %p4467_p6 }
  0xad   : > { %p4217_p4 = por %p4216_p1, %p4215_p0 }
  0xae   : > { %p4211_p13 = pneg %p4210_p12 }
  0xb0   : > { %p4218_p7 = pnand %p4217_p4, %p4211_p13 }
  0xb2   : > { %4221 = shalt.err (!%p4218_p7)
}
  0xb3   : > { %3636 = dma.hbm_to_vmem [thread:$0]  (!%p4457_p5), %s4890_s20, 2048, %s773_s4, [#allocation20], %s4925_s1, %s4925_s1, %s4924_s12  }
  0xb4   : > { %s4233_s27 = scalar_lea.vmem %s787_s2, 16  ;;  %s4240_s9 = scalar_lea.vmem %s787_s2, 32 }
  0xb5   : > { %p4234_p8 = scmp.ne.s32.totalorder %s787_s2, %s4233_s27  ;;  %p4241_p2 = scmp.lt.s32.totalorder %s787_s2, %s787_s2 }
  0xb6   : > { %p4242_p3 = scmp.lt.s32.totalorder %s4240_s9, %s4233_s27 }
  0xb7   : > { %p4236_p9 = pnand %p4234_p8, %p4467_p6 }
  0xb8   : > { %p4243_p11 = por %p4242_p3, %p4241_p2 }
  0xb9   : > { %p4237_p10 = pneg %p4236_p9 }
  0xbb   : > { %p4244_p12 = pnand %p4243_p11, %p4237_p10 }
  0xbd   : > { %4247 = shalt.err (!%p4244_p12)
}
  0xbe   : > { %3639 = dma.hbm_to_vmem [thread:$0]  (!%p4457_p5), %s4891_s21, 16, %s787_s2, [#allocation23]  }
  0xbf   : > { %p4927_p13 = scmp.ne.s32.totalorder %s4914_s6, 0 }
  0xc0   : > { %p4928_p0 = scmp.eq.s32.totalorder (!%p4927_p13), %s4442_s28, 0 }
  0xc1   : > { %806 = sbr.rel (%p4927_p13) target bundleno = 2876 (0xb3c), region = 108 }
  0xc6   : > { %4253 = dma.done.wait (%p4928_p0), [#allocation3], 1024   ;;  %p4929_p6 = pmov %p4928_p0 }
  0xc7   : > { %p4930_p1 = pmov %p4928_p0 }
  0xc8   : > { %4255 = vsyncadd (%p4929_p6), [#allocation3], 4294966272 }
  0xc9   : > { %4257 = dma.done.wait (%p4930_p1), [#allocation5], 2064   ;;  %p4931_p4 = pmov %p4928_p0 }
  0xca   : > { %p4932_p7 = pmov %p4928_p0 }
  0xcb   : > { %4259 = vsyncadd (%p4931_p4), [#allocation5], 4294965232 }
  0xcc   : > { %4261 = dma.done.wait (%p4932_p7), [#allocation8], 1040   ;;  %p4933_p5 = pmov %p4928_p0 }
  0xcd   : > { %p4934_p8 = pmov %p4928_p0 }
  0xce   : > { %4263 = vsyncadd (%p4933_p5), [#allocation8], 4294966256 }
  0xcf   : > { %4265 = dma.done.wait (%p4934_p8), [#allocation11], 4096   ;;  %p4935_p9 = pmov %p4928_p0 }
  0xd0   : > { %p4936_p10 = pmov %p4928_p0 }
  0xd1   : > { %4267 = vsyncadd (%p4935_p9), [#allocation11], 4294963200 }
  0xd2   : > { %4269 = dma.done.wait (%p4936_p10), [#allocation14], 2064   ;;  %p4937_p2 = pmov %p4928_p0 }
  0xd3   : > { %p4938_p3 = pmov %p4928_p0 }
  0xd4   : > { %4271 = vsyncadd (%p4937_p2), [#allocation14], 4294965232 }
  0xd5   : > { %4273 = dma.done.wait (%p4938_p3), [#allocation17], 2080   ;;  %p4939_p11 = pmov %p4928_p0 }
  0xd6   : > { %p4940_p12 = pmov %p4928_p0 }
  0xd7   : > { %4275 = vsyncadd (%p4939_p11), [#allocation17], 4294965216 }
  0xd8   : > { %4277 = dma.done.wait (%p4940_p12), [#allocation20], 2080   ;;  %p4941_p13 = pmov %p4928_p0 }
  0xda   : > { %4279 = vsyncadd (%p4941_p13), [#allocation20], 4294965216 }
  0xdb   : > { %4281 = dma.done.wait (%p4928_p0), [#allocation23], 16   ;;  %p4942_p6 = pmov %p4928_p0 }
  0xdc   : > { %p930_p1 = scmp.lt.s32.totalorder %s4442_s28, 1  ;;  %v4306_v0 = vmov 0.0   ;;  %s4943_s12 = sld [smem:[#allocation32_spill]]  ;;  %v3699_v3 = vld [vmem:[#allocation2 + $0x38] sm:$0xff]   ;;  %v3700_v4 = vld [vmem:[#allocation2 + $0x30] sm:$0xff]   ;;  %v3701_v5 = vld [vmem:[#allocation2 + $0x28] sm:$0xff]  }
  0xdd   : > { %4283 = vsyncadd (%p4942_p6), [#allocation23], 4294967280  ;;  %3389 = vmatprep.subr.bf16.mxu0 %v4306_v0  ;;  %v3702_v6 = vld [vmem:[#allocation2 + $0x20] sm:$0xff]   ;;  %v3703_v7 = vld [vmem:[#allocation2 + $0x18] sm:$0xff]   ;;  %vm4307_vm0 = vmmov 0   ;;  %s4944_s10 = sld [smem:[#allocation33_spill]] }
  0xde   : > { %s4949_s28 = smov (!%p930_p1, %s4442_s28), 1  ;;  %3390 = vmatpush3.bf16.msra.mxu0 %v3699_v3  ;;  %3405 = vmatprep.mubr.msk.bf16.mxu0 %vm4307_vm0, %v4306_v0  ;;  %v3704_v8 = vld [vmem:[#allocation2 + $0x10] sm:$0xff]   ;;  %v3705_v9 = vld [vmem:[#allocation2 + $0x8] sm:$0xff]   ;;  %v3706_v10 = vld [vmem:[#allocation2] sm:$0xff]   ;;  %s4945_s2 = sld [smem:[#allocation35_spill]]  ;;  %v4308_v45 = vmov 0  }
  0xdf   : > { %s4641_s6 = sshll.u32 %s4949_s28, 3  ;;  %3391 = vmatprep.subr.bf16.mxu0 %v4306_v0  ;;  %v3707_v18 = vld [vmem:[#allocation7 + $0x38] sm:$0xff]   ;;  %v3708_v20 = vld [vmem:[#allocation7 + $0x30] sm:$0xff]   ;;  %v3709_v21 = vld [vmem:[#allocation7 + $0x28] sm:$0xff]   ;;  %1232 = vmatprep.mubr.bf16.mxu1 %v4308_v45  ;;  %s4946_s27 = sld [smem:[#allocation40_spill]]  ;;  %vm1786_vm1 = vcmask 1043456  }
  0xe0   : > { %v3710_v22 = vld [vmem:[#allocation7 + $0x20] sm:$0xff]   ;;  %v3711_v23 = vld [vmem:[#allocation7 + $0x18] sm:$0xff]   ;;  %v3712_v24 = vld [vmem:[#allocation7 + $0x10] sm:$0xff]   ;;  %s4947_s25 = sld [smem:[#allocation38_spill]]  ;;  %vm1753_vm3 = vcmask 64512   ;;  %s945_s26 = scalar_lea.vmem %s4894_s24, %s4641_s6 }
  0xe1   : > { %v3713_v25 = vld [vmem:[#allocation7 + $0x8] sm:$0xff]   ;;  %v3714_v26 = vld [vmem:[#allocation7] sm:$0xff]   ;;  %v3715_v27 = vld [vmem:[#allocation6 + $0x74] ss:$8 sps:$4 sm:$0xff]   ;;  %s937_s29 = scalar_lea.vmem %s4892_s22, %s4641_s6 }
  0xe2   : > { %s4647_s1 = scalar_lea.vmem %s4943_s12, %s4641_s6  ;;  %3392 = vmatpush3.bf16.msra.mxu0 %v3700_v4  ;;  %v3717_v28 = vld [vmem:[#allocation6 + $0x70] ss:$8 sps:$4 sm:$0xff]   ;;  %v3718_v29 = vld [vmem:[#allocation6 + $0x64] ss:$8 sps:$4 sm:$0xff]   ;;  %1200 = vmatprep.subr.bf16.mxu1 %v3715_v27  ;;  %v3720_v30 = vld [vmem:[#allocation6 + $0x60] ss:$8 sps:$4 sm:$0xff]  }
  0xe3   : > { %v947_v1 = vld [vmem:[%s4647_s1] sm:$0xff]  ;;  %3393 = vmatprep.subr.bf16.mxu0 %v4306_v0  ;;  %1201 = vmatpush1.bf16.msra.mxu1 %v3717_v28  ;;  %v3723_v39 = vld [vmem:[#allocation6 + $0x50] ss:$8 sps:$4 sm:$0xff]  }
  0xe4   : > { %v949_v2 = vmul.f32 %v947_v1, %v947_v1  ;;  %v3123_v15 = vld [vmem:[%s4944_s10] ss:$0 sm:$0xff]  ;;  %1202 = vmatprep.subr.bf16.mxu1 %v3718_v29  ;;  %v3724_v40 = vld [vmem:[#allocation6 + $0x44] ss:$8 sps:$4 sm:$0xff]   ;;  %v3726_v41 = vld [vmem:[#allocation6 + $0x40] ss:$8 sps:$4 sm:$0xff]  }
  0xe5   : > { %v3124_v31 = vld [vmem:[%s4945_s2] ss:$0 sm:$0xff]  ;;  %v3729_v43 = vld [vmem:[#allocation6 + $0x30] ss:$8 sps:$4 sm:$0xff]   ;;  %v3730_v44 = vld [vmem:[#allocation6 + $0x24] ss:$8 sps:$4 sm:$0xff]  }
  0xe6   : > { %950 = vadd.xlane.f32.xlu0 %v949_v2  ;;  %3394 = vmatpush3.bf16.msra.mxu0 %v3701_v5  ;;  %v3721_v38 = vld [vmem:[#allocation6 + $0x54] ss:$8 sps:$4 sm:$0xff]   ;;  %v3732_v46 = vld [vmem:[#allocation6 + $0x20] ss:$8 sps:$4 sm:$0xff]   ;;  %v3735_v48 = vld [vmem:[#allocation6 + $0x10] ss:$8 sps:$4 sm:$0xff]  }
  0xe7   : > { %3395 = vmatprep.subr.bf16.mxu0 %v4306_v0  ;;  %1203 = vmatpush1.bf16.msra.mxu1 %v3720_v30  ;;  %v3727_v42 = vld [vmem:[#allocation6 + $0x34] ss:$8 sps:$4 sm:$0xff]   ;;  %v3736_v50 = vld [vmem:[#allocation6 + $0x4] ss:$8 sps:$4 sm:$0xff]   ;;  %v3738_v53 = vld [vmem:[#allocation6] ss:$8 sps:$4 sm:$0xff]  }
  0xe8   : > { %1204 = vmatprep.subr.bf16.mxu1 %v3721_v38  ;;  %v3733_v47 = vld [vmem:[#allocation6 + $0x14] ss:$8 sps:$4 sm:$0xff]  }
  0xe9   : > { %v3152_v49 = vld [vmem:[%s4946_s27] ss:$0 sm:$0xff]  ;;  %v3742_v59 = vld [vmem:[#allocation10 + $0x70] sm:$0xff]  }
  0xea   : > { %3396 = vmatpush3.bf16.msra.mxu0 %v3702_v6  ;;  %v3740_v58 = vld [vmem:[#allocation10 + $0x78] sm:$0xff]   ;;  %v3741_v6 = vld [vmem:[#allocation10 + $0x30] sm:$0xff]  }
  0xeb   : > { %3397 = vmatprep.subr.bf16.mxu0 %v4306_v0  ;;  %1205 = vmatpush1.bf16.msra.mxu1 %v3723_v39  ;;  %v3739_v4 = vld [vmem:[#allocation10 + $0x38] sm:$0xff]  }
  0xec   : > { %1206 = vmatprep.subr.bf16.mxu1 %v3724_v40  ;;  %v1108_v27 = vld [vmem:[%s4947_s25] sm:$0x3] }
  0xee   : > { %3398 = vmatpush3.bf16.msra.mxu0 %v3703_v7  ;;  %v3743_v7 = vld [vmem:[#allocation10 + $0x28] sm:$0xff]  }
  0xef   : > { %3399 = vmatprep.subr.bf16.mxu0 %v4306_v0  ;;  %1207 = vmatpush1.bf16.msra.mxu1 %v3726_v41 }
  0xf0   : > { %1208 = vmatprep.subr.bf16.mxu1 %v3727_v42 }
  0xf2   : > { %3400 = vmatpush3.bf16.msra.mxu0 %v3704_v8  ;;  %v3744_v8 = vld [vmem:[#allocation10 + $0x68] sm:$0xff]  }
  0xf3   : > { %3401 = vmatprep.subr.bf16.mxu0 %v4306_v0  ;;  %1209 = vmatpush1.bf16.msra.mxu1 %v3729_v43 }
  0xf4   : > { %1210 = vmatprep.subr.bf16.mxu1 %v3730_v44 }
  0xf6   : > { %3402 = vmatpush3.bf16.msra.mxu0 %v3705_v9  ;;  %v3745_v9 = vld [vmem:[#allocation10 + $0x20] sm:$0xff]  }
  0xf7   : > { %3403 = vmatprep.subr.bf16.mxu0 %v4306_v0  ;;  %1211 = vmatpush1.bf16.msra.mxu1 %v3732_v46 }
  0xf8   : > { %1212 = vmatprep.subr.bf16.mxu1 %v3733_v47 }
  0xfa   : > { %3404 = vmatpush3.bf16.msra.mxu0 %v3706_v10  ;;  %v3746_v10 = vld [vmem:[#allocation10 + $0x60] sm:$0xff]  }
  0xfb   : > { %3409 = vmatprep.subr.bf16.mxu0 %v4306_v0  ;;  %1213 = vmatpush1.bf16.msra.mxu1 %v3735_v48 }
  0xfc   : > { %1214 = vmatprep.subr.bf16.mxu1 %v3736_v50 }
  0xff   : > { %1215 = vmatpush1.bf16.msra.mxu1 %v3738_v53 }
 0x100   : > { %3429 = vmatprep.subr.bf16.mxu1 %v4306_v0 }
 0x16f   : > { %v951_v11 = vpop.xlane.xlu0 %950 }
 0x170   : > { %v953_v12 = vmul.f32 0.0078125, %v951_v11  ;;  %v3747_v11 = vld [vmem:[#allocation10 + $0x18] sm:$0xff]  }
 0x172   : > { %v954_v13 = vadd.f32 1.1920929e-07, %v953_v12  ;;  %v3748_v12 = vld [vmem:[#allocation10 + $0x58] sm:$0xff]  }
 0x174   : > { %3859 = vrsqrt.f32 %v954_v13  ;;  %v3749_v13 = vld [vmem:[#allocation10 + $0x10] sm:$0xff]  }
 0x181   : > { %v3860_v14 = vpop.eup %3859 }
 0x182   : > { %v956_v16 = vmul.f32 %v3860_v14, %v947_v1  ;;  %v3133_v1 = vld [vmem:[#allocation4] ss:$0 sm:$0xff]  ;;  %v3750_v14 = vld [vmem:[#allocation10 + $0x50] sm:$0xff]  }
 0x184   : > { %v963_v17 = vmul.f32 %v3123_v15, %v956_v16  ;;  %v3751_v15 = vld [vmem:[#allocation10 + $0x8] sm:$0xff]  }
 0x185   : > { %v3752_v16 = vld [vmem:[#allocation10 + $0x48] sm:$0xff]  }
 0x186   : > { %v964_v19 = vpack.c.bf16 %v963_v17, %v963_v17  ;;  %v3753_v17 = vld [vmem:[#allocation10] sm:$0xff]  }
 0x188   : > { %3406 = vmatmul.mubr.bf16.vlgmr.msra.gmra.mxu0 %v964_v19 }
 0x189   : > { %3410 = vmatpush3.bf16.msra.mxu0 %v3707_v18  ;;  %3425 = vmatprep.mubr.msk.bf16.mxu0 %vm4307_vm0, %v4306_v0  ;;  %v3754_v18 = vld [vmem:[#allocation10 + $0x40] sm:$0xff]  }
 0x18a   : > { %3411 = vmatprep.subr.bf16.mxu0 %v4306_v0 }
 0x18d   : > { %3412 = vmatpush3.bf16.msra.mxu0 %v3708_v20  ;;  %v1110_v20 = vlaneseq }
 0x18e   : > { %3413 = vmatprep.subr.bf16.mxu0 %v4306_v0 }
 0x191   : > { %3414 = vmatpush3.bf16.msra.mxu0 %v3709_v21 }
 0x192   : > { %3415 = vmatprep.subr.bf16.mxu0 %v4306_v0 }
 0x195   : > { %3416 = vmatpush3.bf16.msra.mxu0 %v3710_v22  ;;  %v4706_v22 = vshrl.u32 %v1110_v20, 7 }
 0x196   : > { %3417 = vmatprep.subr.bf16.mxu0 %v4306_v0 }
 0x197   : > { %v4715_v28 = vsub.s32 1, %v4706_v22 }
 0x199   : > { %3418 = vmatpush3.bf16.msra.mxu0 %v3711_v23 }
 0x19a   : > { %3419 = vmatprep.subr.bf16.mxu0 %v4306_v0 }
 0x19d   : > { %3420 = vmatpush3.bf16.msra.mxu0 %v3712_v24  ;;  %v4709_v24 = vsub.s32 0, %v4706_v22 }
 0x19e   : > { %3421 = vmatprep.subr.bf16.mxu0 %v4306_v0 }
 0x19f   : > { %v1113_v29 = vrot.slane %v1108_v27, %v4709_v24 }
 0x1a1   : > { %3422 = vmatpush3.bf16.msra.mxu0 %v3713_v25  ;;  %v4309_v25 = vmov 1983009808  }
 0x1a2   : > { %3423 = vmatprep.subr.bf16.mxu0 %v4306_v0 }
 0x1a5   : > { %3424 = vmatpush3.bf16.msra.mxu0 %v3714_v26  ;;  %v1243_v26 = vunpack.c.l.s4 %v4309_v25 }
 0x1a6   : > { %3449 = vmatprep.subr.bf16.mxu0 %v4306_v0 }
 0x1a7   : > { %v1244_v30 = vunpack.c.0.s8 %v1243_v26 }
 0x1a8   : > { %3426 = vmatmul.mubr.bf16.vlgmr.msra.gmra.mxu0 %v964_v19 }
 0x1a9   : > { %3465 = vmatprep.mubr.msk.bf16.mxu0 %vm4307_vm0, %v4306_v0  ;;  %3450 = vmatpush3.bf16.msra.mxu0 %v3740_v58 }
 0x1aa   : > { %3451 = vmatprep.subr.bf16.mxu0 %v4306_v0 }
 0x1ad   : > { %3452 = vmatpush3.bf16.msra.mxu0 %v3742_v59 }
 0x1ae   : > { %3453 = vmatprep.subr.bf16.mxu0 %v4306_v0 }
 0x1b1   : > { %3454 = vmatpush3.bf16.msra.mxu0 %v3744_v8 }
 0x1b2   : > { %3455 = vmatprep.subr.bf16.mxu0 %v4306_v0 }
 0x1b5   : > { %3456 = vmatpush3.bf16.msra.mxu0 %v3746_v10 }
 0x1b6   : > { %3457 = vmatprep.subr.bf16.mxu0 %v4306_v0 }
 0x1b9   : > { %3458 = vmatpush3.bf16.msra.mxu0 %v3748_v12 }
 0x1ba   : > { %3459 = vmatprep.subr.bf16.mxu0 %v4306_v0 }
 0x1bd   : > { %3460 = vmatpush3.bf16.msra.mxu0 %v3750_v14 }
 0x1be   : > { %3461 = vmatprep.subr.bf16.mxu0 %v4306_v0 }
 0x1c1   : > { %3462 = vmatpush3.bf16.msra.mxu0 %v3752_v16 }
 0x1c2   : > { %3463 = vmatprep.subr.bf16.mxu0 %v4306_v0 }
 0x1c5   : > { %3464 = vmatpush3.bf16.msra.mxu0 %v3754_v18 }
 0x1c6   : > { %3469 = vmatprep.subr.bf16.mxu0 %v4306_v0 }
 0x248   : > { %v1070_v32 = vpop.f32.mrf.mxu0 }
 0x249   : > { %v1071_v33 = vadd.f32 %v3124_v31, %v1070_v32  ;;  %v4310_v31 = vmov 1934713408  }
 0x24a   : > { %v3407_v34 = vpop.f32.mrf.mxu0  ;;  %v1274_v32 = vunpack.c.l.s4 %v4310_v31 }
 0x24b   : > { %v1077_v35 = vmul.f32 %v1071_v33, %v1071_v33 }
 0x24c   : > { %v1073_v36 = vpop.f32.mrf.mxu0 }
 0x24d   : > { %1078 = vadd.xlane.f32.xlu0 %v1077_v35  ;;  %v1247_v36 = vsub.s32 %v1244_v30, %v4706_v22  ;;  %v1697_v30 = vand.u32 127, %v1110_v20 }
 0x24e   : > { %v3408_v37 = vpop.f32.mrf.mxu0 }
 0x24f   : > { %v1275_v37 = vunpack.c.0.s8 %v1274_v32  ;;  %vm1698_vm2 = vcmp.gt.s32.totalorder %v1697_v30, %v4706_v22  ;;  %v3780_v30 = vld [vmem:[#allocation13 + $0x18] sm:$0xff]  }
 0x250   : > { %v1699_v32 = vsel %vm1698_vm2, -1e+30, %v4306_v0 }
 0x251   : > { %v1278_v46 = vsub.s32 %v1275_v37, %v4706_v22 }
 0x268   : > { %v1464_v51 = vpop.f32.mrf.mxu0 }
 0x269   : > { %v4682_v52 = vadd.f32 %v3152_v49, %v1464_v51 }
 0x26a   : > { %v3427_v54 = vpop.f32.mrf.mxu0 }
 0x26b   : > { %v1471_v55 = vmul.f32 %v4682_v52, %v4682_v52 }
 0x26c   : > { %v1467_v56 = vpop.f32.mrf.mxu0 }
 0x26d   : > { %1472 = vadd.xlane.f32.xlu1 %v1471_v55 }
 0x26e   : > { %v3428_v57 = vpop.f32.mrf.mxu0 }
 0x2d6   : > { %v1079_v60 = vpop.xlane.xlu0 %1078 }
 0x2d7   : > { %v1080_v61 = vmul.f32 0.0078125, %v1079_v60 }
 0x2d9   : > { %v1081_v62 = vadd.f32 1.1920929e-07, %v1080_v61 }
 0x2db   : > { %3861 = vrsqrt.f32 %v1081_v62 }
 0x2e8   : > { %v3862_v63 = vpop.eup %3861 }
 0x2e9   : > { %v1083_v2 = vmul.f32 %v3862_v63, %v1071_v33  ;;  %v1117_v33 = vrot.slane %v1108_v27, %v4715_v28 }
 0x2eb   : > { %v1090_v3 = vmul.f32 %v3133_v1, %v1083_v2 }
 0x2ed   : > { %v1091_v5 = vpack.c.bf16 %v1090_v3, %v1090_v3 }
 0x2ef   : > { %1233 = vmatmul.mubr.bf16.vlgmr.msra.gmra.mxu1 %v1091_v5 }
 0x2f0   : > { %3430 = vmatpush3.bf16.msra.mxu1 %v3739_v4  ;;  %3445 = vmatprep.mubr.msk.bf16.mxu1 %vm4307_vm0, %v4306_v0  ;;  %v3161_v4 = vld [vmem:[#allocation9] ss:$0 sm:$0xff] }
 0x2f1   : > { %3431 = vmatprep.subr.bf16.mxu1 %v4306_v0 }
 0x2f4   : > { %3432 = vmatpush3.bf16.msra.mxu1 %v3741_v6 }
 0x2f5   : > { %3433 = vmatprep.subr.bf16.mxu1 %v4306_v0 }
 0x2f6   : > { %v1473_v19 = vpop.xlane.xlu1 %1472 }
 0x2f7   : > { %v1474_v21 = vmul.f32 0.0078125, %v1473_v19 }
 0x2f8   : > { %3434 = vmatpush3.bf16.msra.mxu1 %v3743_v7 }
 0x2f9   : > { %3435 = vmatprep.subr.bf16.mxu1 %v4306_v0  ;;  %v1475_v23 = vadd.f32 1.1920929e-07, %v1474_v21 }
 0x2fb   : > { %3863 = vrsqrt.f32 %v1475_v23 }
 0x2fc   : > { %3436 = vmatpush3.bf16.msra.mxu1 %v3745_v9 }
 0x2fd   : > { %3437 = vmatprep.subr.bf16.mxu1 %v4306_v0 }
 0x300   : > { %3438 = vmatpush3.bf16.msra.mxu1 %v3747_v11 }
 0x301   : > { %3439 = vmatprep.subr.bf16.mxu1 %v4306_v0 }
 0x304   : > { %3440 = vmatpush3.bf16.msra.mxu1 %v3749_v13 }
 0x305   : > { %3441 = vmatprep.subr.bf16.mxu1 %v4306_v0 }
 0x308   : > { %3442 = vmatpush3.bf16.msra.mxu1 %v3751_v15  ;;  %v3864_v53 = vpop.eup %3863 }
 0x309   : > { %3443 = vmatprep.subr.bf16.mxu1 %v4306_v0  ;;  %v1477_v62 = vmul.f32 %v3864_v53, %v4682_v52  ;;  %v3759_v53 = vld [vmem:[#allocation12 + $0x70] sm:$0xff]  }
 0x30b   : > { %v1484_v9 = vmul.f32 %v3161_v4, %v1477_v62  ;;  %v3758_v4 = vld [vmem:[#allocation12 + $0x28] sm:$0xff]  }
 0x30c   : > { %3444 = vmatpush3.bf16.msra.mxu1 %v3753_v17 }
 0x30d   : > { %3475 = vmatprep.subr.bf16.mxu1 %v4306_v0  ;;  %v1485_v14 = vpack.c.bf16 %v1484_v9, %v1484_v9  ;;  %v3768_v9 = vld [vmem:[#allocation12] sm:$0xff]  }
 0x30f   : > { %v1788_v52 = vsel %vm1786_vm1, %v1485_v14, 0 }
 0x3af   : > { %v1234_v34 = vpop.f32.mrf.mxu1 }
 0x3b0   : > { %v1235_v35 = vadd.f32 %v1234_v34, %v1113_v29 }
 0x3b1   : > { %v1236_v38 = vpop.f32.mrf.mxu1 }
 0x3b2   : > { %v1241_v39 = vcombine.high %v1235_v35, %v4306_v0  ;;  %v1237_v40 = vadd.f32 %v1236_v38, %v1117_v33  ;;  %v1248_v42 = vrot.slane %v1235_v35, %v1247_v36 }
 0x3b3   : > { %v1238_v41 = vpop.f32.mrf.mxu1 }
 0x3b4   : > { %v1256_v43 = vcombine.high %v1237_v40, %v4306_v0  ;;  %v1263_v44 = vrot.slane %v1237_v40, %v1247_v36  ;;  %v1255_v48 = vrot.slane %v1241_v39, %v1247_v36 }
 0x3b5   : > { %v1239_v47 = vpop.f32.mrf.mxu1 }
 0x3b6   : > { %v1270_v49 = vrot.slane %v1256_v43, %v1247_v36  ;;  %v1271_v50 = vcombine.low %v1248_v42, %v1263_v44  ;;  %v1272_v51 = vcombine.high %v1248_v42, %v1263_v44 }
 0x3b8   : > { %v1279_v54 = vrot.slane %v1271_v50, %v1278_v46  ;;  %v1286_v55 = vrot.slane %v1272_v51, %v1278_v46  ;;  %v1287_v56 = vcombine.low %v1255_v48, %v1270_v49  ;;  %v1288_v57 = vcombine.high %v1255_v48, %v1270_v49  ;;  %v3757_v51 = vld [vmem:[#allocation12 + $0x78] sm:$0xff]  }
 0x3ba   : > { %v1295_v58 = vrot.slane %v1287_v56, %v1278_v46  ;;  %v1302_v59 = vrot.slane %v1288_v57, %v1278_v46  ;;  %v1307_v60 = vcombine.low %v1279_v54, %v1286_v55  ;;  %v3150_v61 = vcombine.high %v1279_v54, %v1286_v55  ;;  %v3761_v54 = vld [vmem:[#allocation12 + $0x68] sm:$0xff]   ;;  %v3763_v55 = vld [vmem:[#allocation12 + $0x60] sm:$0xff]   ;;  %v3765_v56 = vld [vmem:[#allocation12 + $0x58] sm:$0xff]  }
 0x3bb   : > { %v3767_v57 = vld [vmem:[#allocation12 + $0x50] sm:$0xff]  }
 0x3bc   : > { %v1314_v63 = vrot.slane %v1307_v60, %v1247_v36  ;;  %v1322_v1 = vrot.slane %v3150_v61, %v1247_v36  ;;  %v1323_v2 = vcombine.low %v1295_v58, %v1302_v59  ;;  %v3151_v3 = vcombine.high %v1295_v58, %v1302_v59 }
 0x3be   : > { %v1330_v5 = vrot.slane %v1323_v2, %v1247_v36  ;;  %v1338_v6 = vrot.slane %v3151_v3, %v1247_v36  ;;  %v1339_v7 = vcombine.low %v1314_v63, %v1322_v1  ;;  %v3755_v1 = vld [vmem:[#allocation12 + $0x38] sm:$0xff]   ;;  %v3756_v3 = vld [vmem:[#allocation12 + $0x30] sm:$0xff]  }
 0x3c0   : > { %v1347_v8 = vcombine.low %v1330_v5, %v1338_v6  ;;  %v1346_v10 = vrot.slane %v1339_v7, %v1278_v46  ;;  %v3760_v5 = vld [vmem:[#allocation12 + $0x20] sm:$0xff]   ;;  %v3762_v6 = vld [vmem:[#allocation12 + $0x18] sm:$0xff]   ;;  %v3764_v7 = vld [vmem:[#allocation12 + $0x10] sm:$0xff]  }
 0x3c2   : > { %v1354_v11 = vrot.slane %v1347_v8, %v1278_v46  ;;  %v3766_v8 = vld [vmem:[#allocation12 + $0x8] sm:$0xff]  }
 0x3c4   : > { %v1355_v12 = vcombine.low %v1346_v10, %v1354_v11  ;;  %v1356_v13 = vcombine.high %v1346_v10, %v1354_v11  ;;  %v3769_v10 = vld [vmem:[#allocation12 + $0x48] sm:$0xff]   ;;  %v3770_v11 = vld [vmem:[#allocation12 + $0x40] sm:$0xff]  }
 0x3c6   : > { %v1357_v15 = vpack.c.bf16 %v1355_v12, %v1355_v12  ;;  %v1358_v16 = vpack.c.bf16 %v1356_v13, %v1356_v13  ;;  %v3771_v12 = vld [vmem:[#allocation13 + $0x78] sm:$0xff]  }
 0x3c8   : > { %3446 = vmatmul.mubr.bf16.vlgmr.msra.gmra.mxu1 %v1357_v15  ;;  %3466 = vmatmul.mubr.bf16.vlgmr.msra.gmra.mxu0 %v1358_v16  ;;  %v3773_v16 = vld [vmem:[#allocation13 + $0x70] sm:$0xff]  }
 0x3c9   : > { %3470 = vmatpush3.bf16.xpose.msra.mxu0 %v1485_v14  ;;  %3476 = vmatpush3.bf16.msra.mxu1 %v1788_v52  ;;  %v3772_v14 = vld [vmem:[#allocation13 + $0x38] sm:$0xff]  }
 0x3ca   : > { %3471 = vmatprep.mubr.msk.bf16.mxu0 %vm4307_vm0, %v4306_v0  ;;  %3477 = vmatprep.mubr.msk.bf16.mxu1 %vm4307_vm0, %v4306_v0 }
 0x3cb   : > { %3481 = vmatprep.subr.bf16.mxu1 %v4306_v0  ;;  %3501 = vmatprep.subr.bf16.mxu0 %v4306_v0 }
 0x488   : > { %v1600_v17 = vpop.f32.mrf.mxu1  ;;  %v1688_v18 = vpop.f32.mrf.mxu0 }
 0x489   : > { %v3276_v19 = vpack.c.bf16 %v1688_v18, %v1600_v17  ;;  %v3774_v18 = vld [vmem:[#allocation13 + $0x30] sm:$0xff]  }
 0x48a   : > { %v3447_v21 = vpop.f32.mrf.mxu1  ;;  %v3467_v23 = vpop.f32.mrf.mxu0 }
 0x48b   : > { %3472 = vmatmul.mubr.bf16.vlgmr.msra.gmra.mxu0 %v3276_v19  ;;  %v3775_v21 = vld [vmem:[#allocation13 + $0x68] sm:$0xff]  }
 0x48c   : > { %v1603_v25 = vpop.f32.mrf.mxu1  ;;  %v1691_v26 = vpop.f32.mrf.mxu0  ;;  %3517 = vmatprep.mubr.msk.bf16.mxu0 %vm4307_vm0, %v4306_v0  ;;  %3502 = vmatpush3.bf16.msra.mxu0 %v3757_v51  ;;  %v3792_v51 = vld [vmem:[%s4886_s16 + $0x60] ss:$8 sps:$4 sm:$0xff]  }
 0x48d   : > { %3503 = vmatprep.subr.bf16.mxu0 %v4306_v0  ;;  %v3776_v25 = vld [vmem:[#allocation13 + $0x28] sm:$0xff]   ;;  %v3777_v26 = vld [vmem:[#allocation13 + $0x60] sm:$0xff]  }
 0x48e   : > { %v3448_v27 = vpop.f32.mrf.mxu1  ;;  %v3468_v29 = vpop.f32.mrf.mxu0 }
 0x48f   : > { %v3778_v27 = vld [vmem:[#allocation13 + $0x20] sm:$0xff]   ;;  %v3779_v29 = vld [vmem:[#allocation13 + $0x58] sm:$0xff]  }
 0x490   : > { %3504 = vmatpush3.bf16.msra.mxu0 %v3759_v53 }
 0x491   : > { %3505 = vmatprep.subr.bf16.mxu0 %v4306_v0 }
 0x494   : > { %3506 = vmatpush3.bf16.msra.mxu0 %v3761_v54 }
 0x495   : > { %3507 = vmatprep.subr.bf16.mxu0 %v4306_v0 }
 0x498   : > { %3508 = vmatpush3.bf16.msra.mxu0 %v3763_v55 }
 0x499   : > { %3509 = vmatprep.subr.bf16.mxu0 %v4306_v0 }
 0x49c   : > { %3510 = vmatpush3.bf16.msra.mxu0 %v3765_v56  ;;  %v3213_v56 = vld [vmem:[%s4883_s13] ss:$0 sm:$0xff] }
 0x49d   : > { %3511 = vmatprep.subr.bf16.mxu0 %v4306_v0 }
 0x4a0   : > { %3512 = vmatpush3.bf16.msra.mxu0 %v3767_v57 }
 0x4a1   : > { %3513 = vmatprep.subr.bf16.mxu0 %v4306_v0 }
 0x4a4   : > { %3514 = vmatpush3.bf16.msra.mxu0 %v3769_v10  ;;  %v3807_v10 = vld [vmem:[%s4885_s15 + $0x10] sm:$0xff]  }
 0x4a5   : > { %3515 = vmatprep.subr.bf16.mxu0 %v4306_v0 }
 0x4a8   : > { %3516 = vmatpush3.bf16.msra.mxu0 %v3770_v11  ;;  %v3808_v11 = vld [vmem:[%s4886_s16 + $0x20] ss:$8 sps:$4 sm:$0xff]  }
 0x4a9   : > { %3521 = vmatprep.subr.bf16.mxu0 %v4306_v0 }
 0x54b   : > { %v1742_v31 = vpop.f32.mrf.mxu0 }
 0x54c   : > { %v1749_v33 = vmul.f32 0.088388346, %v1742_v31  ;;  %v3781_v31 = vld [vmem:[#allocation13 + $0x50] sm:$0xff]  }
 0x54d   : > { %v3473_v34 = vpop.f32.mrf.mxu0 }
 0x54e   : > { %v1751_v35 = vadd.f32 %v1749_v33, %v1699_v32  ;;  %v3783_v33 = vld [vmem:[#allocation13 + $0x48] sm:$0xff]  }
 0x54f   : > { %v1745_v36 = vpop.f32.mrf.mxu0  ;;  %v3784_v34 = vld [vmem:[#allocation13 + $0x8] sm:$0xff]  }
 0x550   : > { %v1750_v37 = vmul.f32 0.088388346, %v1745_v36  ;;  %v1754_v38 = vsel %vm1753_vm3, %v1751_v35, -inf  ;;  %v3786_v36 = vld [vmem:[#allocation13] sm:$0xff]  }
 0x551   : > { %1755 = vmax.xlane.f32.xlu1 %v1754_v38  ;;  %v3474_v39 = vpop.f32.mrf.mxu0 }
 0x552   : > { %v1752_v40 = vadd.f32 %v1750_v37, %v1699_v32  ;;  %v3782_v32 = vld [vmem:[#allocation13 + $0x10] sm:$0xff]  }
 0x554   : > { %v1757_v41 = vsel %vm1753_vm3, %v1752_v40, -inf }
 0x555   : > { %1758 = vmax.xlane.f32.xlu0 %v1757_v41 }
 0x5da   : > { %v1756_v20 = vpop.xlane.xlu1 %1755 }
 0x5db   : > { %v1760_v42 = vsub.f32 %v1751_v35, %v1756_v20  ;;  %v3785_v35 = vld [vmem:[#allocation13 + $0x40] sm:$0xff]  }
 0x5dd   : > { %v1762_v22 = vmul.f32 1.442695, %v1760_v42 }
 0x5de   : > { %v1759_v43 = vpop.xlane.xlu0 %1758 }
 0x5df   : > { %3865 = vpow2.f32 %v1762_v22  ;;  %v1761_v44 = vsub.f32 %v1752_v40, %v1759_v43 }
 0x5e1   : > { %v1764_v46 = vmul.f32 1.442695, %v1761_v44 }
 0x5e3   : > { %3867 = vpow2.f32 %v1764_v46  ;;  %v3787_v46 = vld [vmem:[%s4885_s15 + $0x38] sm:$0xff]  }
 0x5ec   : > { %v3866_v47 = vpop.eup %3865 }
 0x5ed   : > { %v1766_v48 = vsel %vm1753_vm3, %v3866_v47, 0.0 }
 0x5ee   : > { %1767 = vadd.xlane.f32.xlu1 %v1766_v48  ;;  %v3790_v48 = vld [vmem:[%s4886_s16 + $0x74] ss:$8 sps:$4 sm:$0xff]  }
 0x5f0   : > { %v3868_v49 = vpop.eup %3867 }
 0x5f1   : > { %v1769_v50 = vsel %vm1753_vm3, %v3868_v49, 0.0 }
 0x5f2   : > { %1770 = vadd.xlane.f32.xlu0 %v1769_v50  ;;  %v3791_v50 = vld [vmem:[%s4885_s15 + $0x30] sm:$0xff]  }
 0x677   : > { %v1768_v58 = vpop.xlane.xlu1 %1767 }
 0x678   : > { %3869 = vrcp.f32 %v1768_v58  ;;  %v3883_v58 = vld [vmem:[%s4647_s1] sm:$0xff]  ;;  %s941_s1 = scalar_lea.vmem %s4893_s23, %s4641_s6 }
 0x67b   : > { %v1771_v59 = vpop.xlane.xlu0 %1770 }
 0x67c   : > { %3871 = vrcp.f32 %v1771_v59 }
 0x685   : > { %v3870_v60 = vpop.eup %3869 }
 0x686   : > { %v1774_v63 = vmul.f32 %v3870_v60, %v3866_v47  ;;  %v3788_v47 = vld [vmem:[%s4886_s16 + $0x70] ss:$8 sps:$4 sm:$0xff]  }
 0x689   : > { %v3872_v61 = vpop.eup %3871 }
 0x68a   : > { %v1775_v62 = vmul.f32 %v3872_v61, %v3868_v49  ;;  %v3794_v49 = vld [vmem:[%s4886_s16 + $0x64] ss:$8 sps:$4 sm:$0xff]  }
 0x68c   : > { %v3277_v2 = vpack.c.bf16 %v1775_v62, %v1774_v63  ;;  %v3795_v63 = vld [vmem:[%s4885_s15 + $0x28] sm:$0xff]  }
 0x68e   : > { %3478 = vmatmul.mubr.msk.bf16.vlgmr.msra.gmra.mxu1 %vm1753_vm3, %v3277_v2  ;;  %v3796_v2 = vld [vmem:[%s4886_s16 + $0x50] ss:$8 sps:$4 sm:$0xff]  }
 0x68f   : > { %3482 = vmatpush3.bf16.msra.mxu1 %v3755_v1  ;;  %3497 = vmatprep.mubr.msk.bf16.mxu1 %vm4307_vm0, %v4306_v0  ;;  %v3798_v1 = vld [vmem:[%s4886_s16 + $0x54] ss:$8 sps:$4 sm:$0xff]  }
 0x690   : > { %3483 = vmatprep.subr.bf16.mxu1 %v4306_v0 }
 0x693   : > { %3484 = vmatpush3.bf16.msra.mxu1 %v3756_v3  ;;  %v3799_v3 = vld [vmem:[%s4885_s15 + $0x20] sm:$0xff]  }
 0x694   : > { %3485 = vmatprep.subr.bf16.mxu1 %v4306_v0 }
 0x697   : > { %3486 = vmatpush3.bf16.msra.mxu1 %v3758_v4  ;;  %v3802_v4 = vld [vmem:[%s4886_s16 + $0x44] ss:$8 sps:$4 sm:$0xff]  }
 0x698   : > { %3487 = vmatprep.subr.bf16.mxu1 %v4306_v0 }
 0x69b   : > { %3488 = vmatpush3.bf16.msra.mxu1 %v3760_v5  ;;  %v3800_v5 = vld [vmem:[%s4886_s16 + $0x40] ss:$8 sps:$4 sm:$0xff]  }
 0x69c   : > { %3489 = vmatprep.subr.bf16.mxu1 %v4306_v0 }
 0x69f   : > { %3490 = vmatpush3.bf16.msra.mxu1 %v3762_v6  ;;  %v3803_v6 = vld [vmem:[%s4885_s15 + $0x18] sm:$0xff]  }
 0x6a0   : > { %3491 = vmatprep.subr.bf16.mxu1 %v4306_v0 }
 0x6a3   : > { %3492 = vmatpush3.bf16.msra.mxu1 %v3764_v7  ;;  %v3806_v7 = vld [vmem:[%s4886_s16 + $0x34] ss:$8 sps:$4 sm:$0xff]  }
 0x6a4   : > { %3493 = vmatprep.subr.bf16.mxu1 %v4306_v0 }
 0x6a7   : > { %3494 = vmatpush3.bf16.msra.mxu1 %v3766_v8  ;;  %v3804_v8 = vld [vmem:[%s4886_s16 + $0x30] ss:$8 sps:$4 sm:$0xff]  }
 0x6a8   : > { %3495 = vmatprep.subr.bf16.mxu1 %v4306_v0 }
 0x6ab   : > { %3496 = vmatpush3.bf16.msra.mxu1 %v3768_v9  ;;  %v3810_v9 = vld [vmem:[%s4886_s16 + $0x24] ss:$8 sps:$4 sm:$0xff]  }
 0x6ac   : > { %3336 = vmatprep.subr.bf16.mxu1 %v3771_v12  ;;  %v3814_v12 = vld [vmem:[%s4886_s16 + $0x14] ss:$8 sps:$4 sm:$0xff]  }
 0x74e   : > { %v1824_v13 = vpop.f32.mrf.mxu1 }
 0x74f   : > { %v1831_v15 = vpack.c.bf16 %v1824_v13, %v1824_v13  ;;  %v3811_v13 = vld [vmem:[%s4885_s15 + $0x8] sm:$0xff]  }
 0x750   : > { %v3479_v52 = vpop.f32.mrf.mxu1 }
 0x751   : > { %3498 = vmatmul.mubr.bf16.vlgmr.msra.gmra.mxu1 %v1831_v15  ;;  %v3818_v15 = vld [vmem:[%s4886_s16 + $0x4] ss:$8 sps:$4 sm:$0xff]   ;;  %v3816_v52 = vld [vmem:[%s4886_s16] ss:$8 sps:$4 sm:$0xff]  }
 0x752   : > { %v1827_v17 = vpop.f32.mrf.mxu1  ;;  %3337 = vmatpush3.bf16.msra.mxu1 %v3772_v14  ;;  %v3812_v14 = vld [vmem:[%s4886_s16 + $0x10] ss:$8 sps:$4 sm:$0xff]  }
 0x753   : > { %v1832_v19 = vpack.c.bf16 %v1827_v17, %v1827_v17  ;;  %3338 = vmatprep.subr.bf16.mxu1 %v3773_v16  ;;  %v3815_v16 = vld [vmem:[%s4885_s15] sm:$0xff]  }
 0x754   : > { %v3480_v23 = vpop.f32.mrf.mxu1  ;;  %v3821_v17 = vld [vmem:[#allocation18 + $0x74] ss:$8 sps:$4 sm:$0xff]  }
 0x755   : > { %3518 = vmatmul.mubr.bf16.vlgmr.msra.gmra.mxu0 %v1832_v19 }
 0x756   : > { %3339 = vmatpush3.bf16.msra.mxu1 %v3774_v18  ;;  %3537 = vmatprep.mubr.msk.bf16.mxu0 %vm4307_vm0, %v4306_v0 }
 0x757   : > { %3340 = vmatprep.subr.bf16.mxu1 %v3775_v21  ;;  %3522 = vmatpush3.bf16.msra.mxu0 %v3787_v46  ;;  %v3847_v46 = vld [vmem:[#allocation21 + $0x68] sm:$0xff]  }
 0x758   : > { %3523 = vmatprep.subr.bf16.mxu0 %v4306_v0 }
 0x75a   : > { %3341 = vmatpush3.bf16.msra.mxu1 %v3776_v25  ;;  %v3214_v25 = vld [vmem:[#allocation15] ss:$0 sm:$0xff] }
 0x75b   : > { %3342 = vmatprep.subr.bf16.mxu1 %v3777_v26  ;;  %3524 = vmatpush3.bf16.msra.mxu0 %v3791_v50  ;;  %v3851_v50 = vld [vmem:[#allocation21 + $0x58] sm:$0xff]  }
 0x75c   : > { %3525 = vmatprep.subr.bf16.mxu0 %v4306_v0 }
 0x75e   : > { %3343 = vmatpush3.bf16.msra.mxu1 %v3778_v27  ;;  %v3819_v27 = vld [vmem:[#allocation18 + $0x70] ss:$8 sps:$4 sm:$0xff]  }
 0x75f   : > { %3344 = vmatprep.subr.bf16.mxu1 %v3779_v29  ;;  %3526 = vmatpush3.bf16.msra.mxu0 %v3795_v63 }
 0x760   : > { %3527 = vmatprep.subr.bf16.mxu0 %v4306_v0 }
 0x762   : > { %3345 = vmatpush3.bf16.msra.mxu1 %v3780_v30  ;;  %v3824_v30 = vld [vmem:[#allocation18 + $0x64] ss:$8 sps:$4 sm:$0xff]  }
 0x763   : > { %3346 = vmatprep.subr.bf16.mxu1 %v3781_v31  ;;  %3528 = vmatpush3.bf16.msra.mxu0 %v3799_v3  ;;  %v3822_v31 = vld [vmem:[#allocation18 + $0x60] ss:$8 sps:$4 sm:$0xff]  }
 0x764   : > { %3529 = vmatprep.subr.bf16.mxu0 %v4306_v0 }
 0x766   : > { %3347 = vmatpush3.bf16.msra.mxu1 %v3782_v32  ;;  %v3827_v32 = vld [vmem:[#allocation18 + $0x54] ss:$8 sps:$4 sm:$0xff]  }
 0x767   : > { %3348 = vmatprep.subr.bf16.mxu1 %v3783_v33  ;;  %3530 = vmatpush3.bf16.msra.mxu0 %v3803_v6  ;;  %v3825_v33 = vld [vmem:[#allocation18 + $0x50] ss:$8 sps:$4 sm:$0xff]  }
 0x768   : > { %3531 = vmatprep.subr.bf16.mxu0 %v4306_v0 }
 0x76a   : > { %3349 = vmatpush3.bf16.msra.mxu1 %v3784_v34  ;;  %v3830_v34 = vld [vmem:[#allocation18 + $0x44] ss:$8 sps:$4 sm:$0xff]  }
 0x76b   : > { %3350 = vmatprep.subr.bf16.mxu1 %v3785_v35  ;;  %3532 = vmatpush3.bf16.msra.mxu0 %v3807_v10  ;;  %v3828_v35 = vld [vmem:[#allocation18 + $0x40] ss:$8 sps:$4 sm:$0xff]  }
 0x76c   : > { %3533 = vmatprep.subr.bf16.mxu0 %v4306_v0 }
 0x76e   : > { %3351 = vmatpush3.bf16.msra.mxu1 %v3786_v36  ;;  %v3833_v36 = vld [vmem:[#allocation18 + $0x34] ss:$8 sps:$4 sm:$0xff]  }
 0x76f   : > { %2449 = vmatprep.subr.bf16.mxu1 %v3790_v48  ;;  %3534 = vmatpush3.bf16.msra.mxu0 %v3811_v13  ;;  %v3849_v48 = vld [vmem:[#allocation21 + $0x60] sm:$0xff]  }
 0x770   : > { %3535 = vmatprep.subr.bf16.mxu0 %v4306_v0 }
 0x773   : > { %3536 = vmatpush3.bf16.msra.mxu0 %v3815_v16  ;;  %v2506_v16 = vld [vmem:[#allocation19] sm:$0x3] }
 0x774   : > { %2598 = vmatprep.subr.bf16.mxu0 %v3821_v17 }
 0x811   : > { %v1947_v37 = vpop.f32.mrf.mxu1 }
 0x812   : > { %v2041_v20 = vpack.c.bf16 %v1947_v37, %v1947_v37  ;;  %v3831_v37 = vld [vmem:[#allocation18 + $0x30] ss:$8 sps:$4 sm:$0xff]  }
 0x813   : > { %v3499_v38 = vpop.f32.mrf.mxu1 }
 0x814   : > { %v3836_v38 = vld [vmem:[#allocation18 + $0x24] ss:$8 sps:$4 sm:$0xff]  }
 0x815   : > { %v1950_v39 = vpop.f32.mrf.mxu1  ;;  %v2035_v40 = vpop.f32.mrf.mxu0 }
 0x816   : > { %v2042_v41 = vpack.c.bf16 %v2035_v40, %v2035_v40  ;;  %v3834_v39 = vld [vmem:[#allocation18 + $0x20] ss:$8 sps:$4 sm:$0xff]   ;;  %v3839_v40 = vld [vmem:[#allocation18 + $0x14] ss:$8 sps:$4 sm:$0xff]  }
 0x817   : > { %v3500_v42 = vpop.f32.mrf.mxu1  ;;  %v3519_v22 = vpop.f32.mrf.mxu0 }
 0x818   : > { %2203 = vmatprep.mubr.bf16.mxu1 %v2042_v41  ;;  %v3842_v41 = vld [vmem:[#allocation18 + $0x4] ss:$8 sps:$4 sm:$0xff]   ;;  %v3843_v42 = vld [vmem:[#allocation21 + $0x78] sm:$0xff]  }
 0x819   : > { %v2038_v43 = vpop.f32.mrf.mxu0  ;;  %2204 = vmatmul.mubr.bf16.vlgmr.msra.gmra.mxu1 %v2041_v20  ;;  %v3840_v20 = vld [vmem:[#allocation18] ss:$8 sps:$4 sm:$0xff]  }
 0x81a   : > { %2481 = vmatprep.mubr.bf16.mxu1 %v4308_v45  ;;  %2450 = vmatpush1.bf16.msra.mxu1 %v3788_v47  ;;  %v3844_v22 = vld [vmem:[#allocation21 + $0x38] sm:$0xff]   ;;  %v3845_v43 = vld [vmem:[#allocation21 + $0x70] sm:$0xff]   ;;  %v3848_v47 = vld [vmem:[#allocation21 + $0x28] sm:$0xff]  }
 0x81b   : > { %v3520_v44 = vpop.f32.mrf.mxu0  ;;  %2451 = vmatprep.subr.bf16.mxu1 %v3794_v49  ;;  %v3850_v49 = vld [vmem:[#allocation21 + $0x20] sm:$0xff]  }
 0x81c   : > { %v3846_v44 = vld [vmem:[#allocation21 + $0x30] sm:$0xff]  }
 0x81e   : > { %2452 = vmatpush1.bf16.msra.mxu1 %v3792_v51  ;;  %v3852_v51 = vld [vmem:[#allocation21 + $0x18] sm:$0xff]  }
 0x81f   : > { %2453 = vmatprep.subr.bf16.mxu1 %v3798_v1 }
 0x822   : > { %2454 = vmatpush1.bf16.msra.mxu1 %v3796_v2 }
 0x823   : > { %2455 = vmatprep.subr.bf16.mxu1 %v3802_v4 }
 0x826   : > { %2456 = vmatpush1.bf16.msra.mxu1 %v3800_v5 }
 0x827   : > { %2457 = vmatprep.subr.bf16.mxu1 %v3806_v7 }
 0x82a   : > { %2458 = vmatpush1.bf16.msra.mxu1 %v3804_v8 }
 0x82b   : > { %2459 = vmatprep.subr.bf16.mxu1 %v3810_v9 }
 0x82e   : > { %2460 = vmatpush1.bf16.msra.mxu1 %v3808_v11 }
 0x82f   : > { %2461 = vmatprep.subr.bf16.mxu1 %v3814_v12 }
 0x832   : > { %2462 = vmatpush1.bf16.msra.mxu1 %v3812_v14 }
 0x833   : > { %2463 = vmatprep.subr.bf16.mxu1 %v3818_v15 }
 0x836   : > { %2464 = vmatpush1.bf16.msra.mxu1 %v3816_v52  ;;  %v2511_v52 = vrot.slane %v2506_v16, %v4709_v24 }
 0x837   : > { %3367 = vmatprep.subr.bf16.mxu1 %v3843_v42 }
 0x8d9   : > { %v3352_v53 = vpop.f32.mrf.mxu1 }
 0x8db   : > { %v3353_v54 = vpop.f32.mrf.mxu1 }
 0x8dc   : > { %v3354_v55 = vadd.f32 %v3353_v54, %v3352_v53  ;;  %v3853_v53 = vld [vmem:[#allocation21 + $0x50] sm:$0xff]  }
 0x8dd   : > { %v3355_v57 = vpop.f32.mrf.mxu1  ;;  %v3854_v54 = vld [vmem:[#allocation21 + $0x10] sm:$0xff]  }
 0x8de   : > { %v2211_v59 = vadd.f32 %v3883_v58, %v3354_v55  ;;  %v3855_v55 = vld [vmem:[#allocation21 + $0x48] sm:$0xff]   ;;  %v3857_v57 = vld [vmem:[#allocation21 + $0x40] sm:$0xff]  }
 0x8df   : > { %v3356_v60 = vpop.f32.mrf.mxu1  ;;  %v3858_v58 = vld [vmem:[#allocation21] sm:$0xff]  }
 0x8e0   : > { %v4784_v61 = vadd.f32 %v3213_v56, %v2211_v59  ;;  %v3856_v56 = vld [vmem:[#allocation21 + $0x8] sm:$0xff]   ;;  %v2357_v59 = vld [vmem:[#allocation16] sm:$0x3] }
 0x8e1   : > { %v2362_v60 = vrot.slane %v2357_v59, %v4709_v24 }
 0x8e2   : > { %v2221_v62 = vmul.f32 %v4784_v61, %v4784_v61 }
 0x8e4   : > { %2222 = vadd.xlane.f32.xlu1 %v2221_v62  ;;  %v2366_v62 = vrot.slane %v2357_v59, %v4715_v28 }
 0x96d   : > { %v2223_v18 = vpop.xlane.xlu1 %2222 }
 0x96e   : > { %v2224_v19 = vmul.f32 0.0078125, %v2223_v18  ;;  %v2515_v18 = vrot.slane %v2506_v16, %v4715_v28 }
 0x970   : > { %v2225_v21 = vadd.f32 1.1920929e-07, %v2224_v19 }
 0x972   : > { %3873 = vrsqrt.f32 %v2225_v21 }
 0x97f   : > { %v3874_v23 = vpop.eup %3873 }
 0x980   : > { %v2227_v26 = vmul.f32 %v3874_v23, %v4784_v61 }
 0x982   : > { %v2234_v0 = vmul.f32 %v3214_v25, %v2227_v26 }
 0x984   : > { %v2235_v29 = vpack.c.bf16 %v2234_v0, %v2234_v0  ;;  %2834 = vst [vmem:[%s941_s1] sm:$0xff] %v2234_v0 }
 0x986   : > { %3538 = vmatmul.mubr.bf16.vlgmr.msra.gmra.mxu0 %v2235_v29  ;;  %2482 = vmatmul.mubr.bf16.vlgmr.msra.gmra.mxu1 %v2235_v29 }
 0x987   : > { %2599 = vmatpush1.bf16.msra.mxu0 %v3819_v27  ;;  %2630 = vmatprep.mubr.bf16.mxu0 %v4308_v45  ;;  %v3837_v45 = vld [vmem:[#allocation18 + $0x10] ss:$8 sps:$4 sm:$0xff]  }
 0x988   : > { %2600 = vmatprep.subr.bf16.mxu0 %v3824_v30  ;;  %3368 = vmatpush3.bf16.msra.mxu1 %v3844_v22 }
 0x989   : > { %3369 = vmatprep.subr.bf16.mxu1 %v3845_v43 }
 0x98b   : > { %2601 = vmatpush1.bf16.msra.mxu0 %v3822_v31 }
 0x98c   : > { %2602 = vmatprep.subr.bf16.mxu0 %v3827_v32  ;;  %3370 = vmatpush3.bf16.msra.mxu1 %v3846_v44 }
 0x98d   : > { %3371 = vmatprep.subr.bf16.mxu1 %v3847_v46 }
 0x98f   : > { %2603 = vmatpush1.bf16.msra.mxu0 %v3825_v33 }
 0x990   : > { %2604 = vmatprep.subr.bf16.mxu0 %v3830_v34  ;;  %3372 = vmatpush3.bf16.msra.mxu1 %v3848_v47 }
 0x991   : > { %3373 = vmatprep.subr.bf16.mxu1 %v3849_v48 }
 0x993   : > { %2605 = vmatpush1.bf16.msra.mxu0 %v3828_v35  ;;  %v3257_v35 = vld [vmem:[#allocation22] ss:$0 sm:$0xff] }
 0x994   : > { %2606 = vmatprep.subr.bf16.mxu0 %v3833_v36  ;;  %3374 = vmatpush3.bf16.msra.mxu1 %v3850_v49 }
 0x995   : > { %3375 = vmatprep.subr.bf16.mxu1 %v3851_v50 }
 0x997   : > { %2607 = vmatpush1.bf16.msra.mxu0 %v3831_v37 }
 0x998   : > { %2608 = vmatprep.subr.bf16.mxu0 %v3836_v38  ;;  %3376 = vmatpush3.bf16.msra.mxu1 %v3852_v51 }
 0x999   : > { %3377 = vmatprep.subr.bf16.mxu1 %v3853_v53 }
 0x99b   : > { %2609 = vmatpush1.bf16.msra.mxu0 %v3834_v39 }
 0x99c   : > { %2610 = vmatprep.subr.bf16.mxu0 %v3839_v40  ;;  %3378 = vmatpush3.bf16.msra.mxu1 %v3854_v54 }
 0x99d   : > { %3379 = vmatprep.subr.bf16.mxu1 %v3855_v55 }
 0x99f   : > { %2611 = vmatpush1.bf16.msra.mxu0 %v3837_v45 }
 0x9a0   : > { %2612 = vmatprep.subr.bf16.mxu0 %v3842_v41  ;;  %3380 = vmatpush3.bf16.msra.mxu1 %v3856_v56 }
 0x9a1   : > { %3381 = vmatprep.subr.bf16.mxu1 %v3857_v57 }
 0x9a3   : > { %2613 = vmatpush1.bf16.msra.mxu0 %v3840_v20 }
 0x9a4   : > { %3382 = vmatpush3.bf16.msra.mxu1 %v3858_v58 }
 0x9a6   : > { %2631 = vmatmul.mubr.bf16.vlgmr.msra.gmra.mxu0 %v2235_v29 }
 0xa46   : > { %v2334_v63 = vpop.f32.mrf.mxu0  ;;  %v2483_v1 = vpop.f32.mrf.mxu1 }
 0xa47   : > { %2340 = vst.msk [vmem:[%s945_s26] sm:$0xff] %vm1753_vm3, %v2334_v63  ;;  %v2484_v2 = vadd.f32 %v2483_v1, %v2362_v60 }
 0xa48   : > { %v3539_v3 = vpop.f32.mrf.mxu0  ;;  %v2485_v4 = vpop.f32.mrf.mxu1 }
 0xa49   : > { %v3255_v5 = vmul.f32 -1.442695, %v2484_v2  ;;  %v2486_v6 = vadd.f32 %v2485_v4, %v2366_v62 }
 0xa4a   : > { %v2337_v7 = vpop.f32.mrf.mxu0  ;;  %v2487_v8 = vpop.f32.mrf.mxu1 }
 0xa4b   : > { %3875 = vpow2.f32 %v3255_v5  ;;  %v3256_v9 = vmul.f32 -1.442695, %v2486_v6 }
 0xa4c   : > { %v3540_v10 = vpop.f32.mrf.mxu0  ;;  %v2488_v11 = vpop.f32.mrf.mxu1 }
 0xa4d   : > { %3877 = vpow2.f32 %v3256_v9 }
 0xa58   : > { %v3876_v12 = vpop.eup %3875 }
 0xa59   : > { %v2645_v13 = vadd.f32 1.0, %v3876_v12 }
 0xa5a   : > { %v3878_v14 = vpop.eup %3877 }
 0xa5b   : > { %3879 = vrcp.f32 %v2645_v13  ;;  %v2646_v15 = vadd.f32 1.0, %v3878_v14 }
 0xa5d   : > { %3881 = vrcp.f32 %v2646_v15 }
 0xa66   : > { %v2632_v17 = vpop.f32.mrf.mxu0 }
 0xa67   : > { %v2633_v26 = vadd.f32 %v2632_v17, %v2511_v52 }
 0xa68   : > { %v3880_v19 = vpop.eup %3879  ;;  %v2634_v21 = vpop.f32.mrf.mxu0 }
 0xa69   : > { %v2651_v23 = vmul.f32 %v3880_v19, %v2484_v2  ;;  %v2635_v29 = vadd.f32 %v2634_v21, %v2515_v18 }
 0xa6a   : > { %v3882_v25 = vpop.eup %3881  ;;  %v2636_v0 = vpop.f32.mrf.mxu0 }
 0xa6b   : > { %v2652_v27 = vmul.f32 %v3882_v25, %v2486_v6  ;;  %v2653_v30 = vmul.f32 %v2651_v23, %v2633_v26 }
 0xa6c   : > { %v2637_v31 = vpop.f32.mrf.mxu0 }
 0xa6d   : > { %v2654_v32 = vmul.f32 %v2652_v27, %v2635_v29  ;;  %v2655_v34 = vpack.c.bf16 %v2653_v30, %v2653_v30 }
 0xa6f   : > { %v2656_v33 = vpack.c.bf16 %v2654_v32, %v2654_v32 }
 0xa71   : > { %2824 = vmatprep.mubr.bf16.mxu1 %v2656_v33 }
 0xa72   : > { %2825 = vmatmul.mubr.bf16.vlgmr.msra.gmra.mxu1 %v2655_v34 }
 0xb32   : > { %v3383_v24 = vpop.f32.mrf.mxu1 }
 0xb34   : > { %v3384_v36 = vpop.f32.mrf.mxu1 }
 0xb35   : > { %v3385_v28 = vadd.f32 %v3384_v36, %v3383_v24 }
 0xb36   : > { %v3386_v37 = vpop.f32.mrf.mxu1 }
 0xb37   : > { %v2827_v38 = vadd.f32 %v3385_v28, %v3257_v35 }
 0xb38   : > { %v3387_v39 = vpop.f32.mrf.mxu1 }
 0xb39   : > { %v2832_v40 = vadd.f32 %v2827_v38, %v4784_v61 }
 0xb3b   : > { %2833 = vst [vmem:[%s937_s29] sm:$0xff] %v2832_v40 }
 0xb3c PF: > { %s43_s5 = sadd.s32 1, %s4286_s5  }
 0xb3d   : > { %p40_p4 = scmp.ge.s32.totalorder %s43_s5, 4  }
 0xb3f   :  { %42 = sbr.rel (!%p40_p4) target bundleno = 21 (0x15), region = 219 }
 0xb44   :  { %2882 = vsyncpa [#allocation3], 1 }
 0xb45   :  { %2884 = vsyncpa [#allocation3 + $0x1], 1 }
 0xb46   :  { %2885 = vsyncpa [#allocation5], 1 }
 0xb47   :  { %2886 = vsyncpa [#allocation8], 1 }
 0xb48   :  { %2887 = vsyncpa [#allocation11], 1 }
 0xb49   :  { %2888 = vsyncpa [#allocation14], 1 }
 0xb4a   :  { %2889 = vsyncpa [#allocation17], 1 }
 0xb4b   :  { %2890 = vsyncpa [#allocation20], 1 }
 0xb4c   :  { %2891 = vsyncpa [#allocation23], 1 }

// kernel: transformer_forward.5
= control target key start
LH: loop header
LB: loop body
LE: loop exit
PB: predicated region body
PF: predicated region fallthrough
CT: control target
= control target key end

     0   :  { %s1234_s0 = inlined_call_operand.vmem [shape: s32[11], index: 0, kind: input, shape index: {}]   ;;  %s1235_s1 = inlined_call_operand.vmem [shape: f32[88,128], index: 1, kind: input, shape index: {}]   ;;  %s1236_s2 = inlined_call_operand.vmem [shape: bf16[8,128,128], index: 2, kind: input, shape index: {}]   ;;  %s1237_s3 = inlined_call_operand.vmem [shape: f32[8,1,128], index: 3, kind: input, shape index: {}]   ;;  %s1238_s4 = inlined_call_operand.vmem [shape: bf16[8,128,128], index: 4, kind: input, shape index: {}]   ;;  %s1239_s5 = inlined_call_operand.vmem [shape: f32[8,1,128], index: 5, kind: input, shape index: {}]   ;;  %s1240_s6 = inlined_call_operand.vmem [shape: bf16[8,128,128], index: 6, kind: input, shape index: {}]   ;;  %s1241_s7 = inlined_call_operand.vmem [shape: f32[8,1,128], index: 7, kind: input, shape index: {}]   ;;  %s1242_s8 = inlined_call_operand.vmem [shape: f32[88,128], index: 8, kind: output, shape index: {}]  }
   0x1   :  { %s13_s29 = sshll.u32 %s1234_s0, 4  ;;  %s14_s29 = int_to_ptr.vmem [resolvable:$true] %s13_s29 }
   0x2   :  { %s1059_s30 = scalar_lea.vmem %s14_s29, 16  ;;  %p1064_p1 = scmp.lt.s32.totalorder %s14_s29, %s14_s29 }
   0x3   :  { %p1060_p0 = scmp.ne.s32.totalorder %s14_s29, %s1059_s30  ;;  %p1065_p2 = scmp.lt.s32.totalorder %s1059_s30, %s1059_s30 }
   0x5   :  { %p1066_p3 = por %p1065_p2, %p1064_p1 }
   0x7   :  { %p1067_p4 = pnand %p1066_p3, %p1060_p0 }
   0x9   :  { %1070 = shalt.err (!%p1067_p4)  }
   0xa   :  { %s1081_s9 = smov [#allocation3]  }
   0xb   :  { %16 = dma.vmem_to_smem %s14_s29, 16, %s1081_s9, [#allocation2] }
   0xc   :  { %1075 = dma.done.wait [#allocation2], 16 }
   0xd   :  { %1076 = vsyncadd [#allocation2], 4294967280 }
   0xe   :  { %18 = sfence }
   0xf   :  { %s1132_s10 = smov 0  }
  0x10 LB: > { %s1138_s0 = sadd.s32 4294967295, %s1079_s10   ;;  %p891_p5 = scmp.ge.s32.totalorder %s1079_s10, 1  ;;  %s1079_s10 = sphi %s1132_s10, %s24_s10  }
  0x11   : > { %p321_p6 = scmp.lt.s32.totalorder %s1079_s10, 12 }
  0x13   : > { %p322_p7 = pnand %p891_p5, %p321_p6 }
  0x14   : > { %s385_s11 = sld [smem:[#allocation3 + %s1138_s0]] (!%p322_p7)  ;;  %p381_p10 = scmp.lt.s32.totalorder (!%p322_p7), %s1138_s0, 10 }
  0x15   : > { %325 = sbr.rel (%p322_p7) target bundleno = 495 (0x1ef), region = 48  ;;  %s397_s12 = sld [smem:[#allocation3 + %s1138_s0]] (!%p322_p7) }
  0x16   : > { %s409_s26 = sld [smem:[#allocation3 + %s1138_s0]] (!%p322_p7) }
  0x17   : > { %s392_s9 = sld [smem:[#allocation3 + %s1138_s0]] (!%p322_p7) }
  0x18   : > { %s404_s14 = sld [smem:[#allocation3 + %s1138_s0]] (!%p322_p7) }
  0x19   : > { %s416_s18 = sld [smem:[#allocation3 + %s1138_s0]] (!%p322_p7) }
  0x1a   : > { %v1082_v0 = vmov 0.0   ;;  %vm1083_vm0 = vmmov 0   ;;  %p386_p8 = scmp.lt.s32.totalorder %s385_s11, 7 }
  0x1b   : > { %960 = vmatprep.subr.bf16.mxu0 %v1082_v0  ;;  %980 = vmatprep.subr.bf16.mxu1 %v1082_v0  ;;  %p398_p9 = scmp.lt.s32.totalorder %s397_s12, 7 }
  0x1c   : > { %976 = vmatprep.mubr.msk.bf16.mxu0 %vm1083_vm0, %v1082_v0  ;;  %996 = vmatprep.mubr.msk.bf16.mxu1 %vm1083_vm0, %v1082_v0  ;;  %s1244_s11 = smov (!%p386_p8, %s385_s11), 7  ;;  %p410_p11 = scmp.lt.s32.totalorder %s409_s26, 7 }
  0x1d   : > { %s1246_s12 = smov (!%p398_p9, %s397_s12), 7  ;;  %s930_s13 = sshll.u32 %s1244_s11, 6 }
  0x1e   : > { %s1153_s16 = scalar_lea.vmem %s1236_s2, %s930_s13  ;;  %s931_s17 = sshll.u32 %s1246_s12, 6 }
  0x1f   : > { %v1031_v1 = vld [vmem:[%s1153_s16 + $0x38] sm:$0xff]   ;;  %v1032_v2 = vld [vmem:[%s1153_s16 + $0x30] sm:$0xff]   ;;  %s1161_s20 = scalar_lea.vmem %s1238_s4, %s931_s17  ;;  %v1033_v3 = vld [vmem:[%s1153_s16 + $0x28] sm:$0xff]   ;;  %s1248_s26 = smov (!%p410_p11, %s409_s26), 7 }
  0x20   : > { %961 = vmatpush3.bf16.msra.mxu0 %v1031_v1  ;;  %v1039_v4 = vld [vmem:[%s1161_s20 + $0x38] sm:$0xff]   ;;  %v1034_v5 = vld [vmem:[%s1153_s16 + $0x20] sm:$0xff]   ;;  %v1040_v6 = vld [vmem:[%s1161_s20 + $0x30] sm:$0xff]   ;;  %s1176_s21 = scalar_select %p381_p10, %s1138_s0, 10 }
  0x21   : > { %962 = vmatprep.subr.bf16.mxu0 %v1082_v0  ;;  %981 = vmatpush3.bf16.msra.mxu1 %v1039_v4  ;;  %v1035_v7 = vld [vmem:[%s1153_s16 + $0x18] sm:$0xff]   ;;  %v1041_v8 = vld [vmem:[%s1161_s20 + $0x28] sm:$0xff]   ;;  %v1036_v9 = vld [vmem:[%s1153_s16 + $0x10] sm:$0xff]   ;;  %s932_s27 = sshll.u32 %s1248_s26, 6  ;;  %p393_p12 = scmp.lt.s32.totalorder %s392_s9, 7 }
  0x22   : > { %982 = vmatprep.subr.bf16.mxu1 %v1082_v0  ;;  %v1042_v10 = vld [vmem:[%s1161_s20 + $0x20] sm:$0xff]   ;;  %s892_s22 = sshll.u32 %s1176_s21, 3  ;;  %v1037_v11 = vld [vmem:[%s1153_s16 + $0x8] sm:$0xff]   ;;  %v1043_v12 = vld [vmem:[%s1161_s20 + $0x18] sm:$0xff]   ;;  %s414_s30 = scalar_lea.vmem %s1240_s6, %s932_s27 }
  0x23   : > { %s384_s25 = scalar_lea.vmem %s1235_s1, %s892_s22  ;;  %v1038_v13 = vld [vmem:[%s1153_s16] sm:$0xff]   ;;  %v1044_v15 = vld [vmem:[%s1161_s20 + $0x10] sm:$0xff]   ;;  %v1045_v17 = vld [vmem:[%s1161_s20 + $0x8] sm:$0xff]   ;;  %s1250_s9 = smov (!%p393_p12, %s392_s9), 7 }
  0x24   : > { %963 = vmatpush3.bf16.msra.mxu0 %v1032_v2  ;;  %v426_v14 = vld [vmem:[%s384_s25] sm:$0xff]  ;;  %v1047_v19 = vld [vmem:[%s414_s30 + $0x38] sm:$0xff]   ;;  %v1048_v20 = vld [vmem:[%s414_s30 + $0x30] sm:$0xff]   ;;  %s395_s13 = scalar_lea.vmem %s1237_s3, %s1250_s9  ;;  %p405_p13 = scmp.lt.s32.totalorder %s404_s14, 7 }
  0x25   : > { %964 = vmatprep.subr.bf16.mxu0 %v1082_v0  ;;  %983 = vmatpush3.bf16.msra.mxu1 %v1040_v6  ;;  %v427_v16 = vpack.c.bf16 %v426_v14, %v426_v14  ;;  %v1046_v18 = vld [vmem:[%s1161_s20] sm:$0xff]   ;;  %v1049_v21 = vld [vmem:[%s414_s30 + $0x28] sm:$0xff]   ;;  %v1051_v23 = vld [vmem:[%s414_s30 + $0x18] sm:$0xff]   ;;  %p417_p0 = scmp.lt.s32.totalorder %s416_s18, 7  ;;  %s424_s26 = scalar_lea.vmem %s1242_s8, %s892_s22 }
  0x26   : > { %984 = vmatprep.subr.bf16.mxu1 %v1082_v0  ;;  %v1050_v22 = vld [vmem:[%s414_s30 + $0x20] sm:$0xff]   ;;  %v1052_v24 = vld [vmem:[%s414_s30 + $0x10] sm:$0xff]   ;;  %v1053_v25 = vld [vmem:[%s414_s30 + $0x8] sm:$0xff]   ;;  %s1252_s14 = smov (!%p405_p13, %s404_s14), 7 }
  0x27   : > { %v1054_v26 = vld [vmem:[%s414_s30] sm:$0xff]   ;;  %s407_s17 = scalar_lea.vmem %s1239_s5, %s1252_s14  ;;  %s1254_s18 = smov (!%p417_p0, %s416_s18), 7 }
  0x28   : > { %965 = vmatpush3.bf16.msra.mxu0 %v1033_v3  ;;  %v900_v27 = vld [vmem:[%s395_s13] ss:$0 sm:$0xff]  ;;  %s419_s23 = scalar_lea.vmem %s1241_s7, %s1254_s18 }
  0x29   : > { %966 = vmatprep.subr.bf16.mxu0 %v1082_v0  ;;  %985 = vmatpush3.bf16.msra.mxu1 %v1041_v8  ;;  %v909_v40 = vld [vmem:[%s407_s17] ss:$0 sm:$0xff] }
  0x2a   : > { %986 = vmatprep.subr.bf16.mxu1 %v1082_v0  ;;  %v919_v46 = vld [vmem:[%s419_s23] ss:$0 sm:$0xff] }
  0x2c   : > { %967 = vmatpush3.bf16.msra.mxu0 %v1034_v5 }
  0x2d   : > { %968 = vmatprep.subr.bf16.mxu0 %v1082_v0  ;;  %987 = vmatpush3.bf16.msra.mxu1 %v1042_v10 }
  0x2e   : > { %988 = vmatprep.subr.bf16.mxu1 %v1082_v0 }
  0x30   : > { %969 = vmatpush3.bf16.msra.mxu0 %v1035_v7 }
  0x31   : > { %970 = vmatprep.subr.bf16.mxu0 %v1082_v0  ;;  %989 = vmatpush3.bf16.msra.mxu1 %v1043_v12 }
  0x32   : > { %990 = vmatprep.subr.bf16.mxu1 %v1082_v0 }
  0x34   : > { %971 = vmatpush3.bf16.msra.mxu0 %v1036_v9 }
  0x35   : > { %972 = vmatprep.subr.bf16.mxu0 %v1082_v0  ;;  %991 = vmatpush3.bf16.msra.mxu1 %v1044_v15 }
  0x36   : > { %992 = vmatprep.subr.bf16.mxu1 %v1082_v0 }
  0x38   : > { %973 = vmatpush3.bf16.msra.mxu0 %v1037_v11 }
  0x39   : > { %974 = vmatprep.subr.bf16.mxu0 %v1082_v0  ;;  %993 = vmatpush3.bf16.msra.mxu1 %v1045_v17 }
  0x3a   : > { %994 = vmatprep.subr.bf16.mxu1 %v1082_v0 }
  0x3c   : > { %975 = vmatpush3.bf16.msra.mxu0 %v1038_v13 }
  0x3d   : > { %1000 = vmatprep.subr.bf16.mxu0 %v1082_v0  ;;  %995 = vmatpush3.bf16.msra.mxu1 %v1046_v18 }
  0x3f   : > { %977 = vmatmul.mubr.bf16.vlgmr.msra.gmra.mxu0 %v427_v16 }
  0x40   : > { %1016 = vmatprep.mubr.msk.bf16.mxu0 %vm1083_vm0, %v1082_v0  ;;  %997 = vmatmul.mubr.bf16.vlgmr.msra.gmra.mxu1 %v427_v16 }
  0x41   : > { %1001 = vmatpush3.bf16.msra.mxu0 %v1047_v19 }
  0x42   : > { %1002 = vmatprep.subr.bf16.mxu0 %v1082_v0 }
  0x45   : > { %1003 = vmatpush3.bf16.msra.mxu0 %v1048_v20 }
  0x46   : > { %1004 = vmatprep.subr.bf16.mxu0 %v1082_v0 }
  0x49   : > { %1005 = vmatpush3.bf16.msra.mxu0 %v1049_v21 }
  0x4a   : > { %1006 = vmatprep.subr.bf16.mxu0 %v1082_v0 }
  0x4d   : > { %1007 = vmatpush3.bf16.msra.mxu0 %v1050_v22 }
  0x4e   : > { %1008 = vmatprep.subr.bf16.mxu0 %v1082_v0 }
  0x51   : > { %1009 = vmatpush3.bf16.msra.mxu0 %v1051_v23 }
  0x52   : > { %1010 = vmatprep.subr.bf16.mxu0 %v1082_v0 }
  0x55   : > { %1011 = vmatpush3.bf16.msra.mxu0 %v1052_v24 }
  0x56   : > { %1012 = vmatprep.subr.bf16.mxu0 %v1082_v0 }
  0x59   : > { %1013 = vmatpush3.bf16.msra.mxu0 %v1053_v25 }
  0x5a   : > { %1014 = vmatprep.subr.bf16.mxu0 %v1082_v0 }
  0x5d   : > { %1015 = vmatpush3.bf16.msra.mxu0 %v1054_v26 }
  0xff   : > { %v533_v28 = vpop.f32.mrf.mxu0 }
 0x100   : > { %v534_v29 = vadd.f32 %v900_v27, %v533_v28  ;;  %v644_v34 = vpop.f32.mrf.mxu1 }
 0x101   : > { %v978_v30 = vpop.f32.mrf.mxu0  ;;  %v645_v41 = vadd.f32 %v909_v40, %v644_v34 }
 0x102   : > { %v918_v31 = vmul.f32 -1.442695, %v534_v29  ;;  %v998_v35 = vpop.f32.mrf.mxu1 }
 0x103   : > { %v536_v32 = vpop.f32.mrf.mxu0 }
 0x104   : > { %1055 = vpow2.f32 %v918_v31  ;;  %v647_v36 = vpop.f32.mrf.mxu1 }
 0x105   : > { %v979_v33 = vpop.f32.mrf.mxu0 }
 0x106   : > { %v999_v37 = vpop.f32.mrf.mxu1 }
 0x111   : > { %v1056_v38 = vpop.eup %1055 }
 0x112   : > { %v653_v39 = vadd.f32 1.0, %v1056_v38 }
 0x114   : > { %1057 = vrcp.f32 %v653_v39 }
 0x121   : > { %v1058_v42 = vpop.eup %1057 }
 0x122   : > { %v656_v43 = vmul.f32 %v1058_v42, %v534_v29 }
 0x124   : > { %v657_v44 = vmul.f32 %v656_v43, %v645_v41 }
 0x126   : > { %v658_v45 = vpack.c.bf16 %v657_v44, %v657_v44 }
 0x128   : > { %1017 = vmatmul.mubr.bf16.vlgmr.msra.gmra.mxu0 %v658_v45 }
 0x1e8   : > { %v764_v47 = vpop.f32.mrf.mxu0 }
 0x1e9   : > { %v765_v48 = vadd.f32 %v919_v46, %v764_v47 }
 0x1ea   : > { %v1018_v49 = vpop.f32.mrf.mxu0 }
 0x1eb   : > { %770 = vst [vmem:[%s424_s26] sm:$0xff] %v765_v48 }
 0x1ec   : > { %v767_v50 = vpop.f32.mrf.mxu0 }
 0x1ee   : > { %v1019_v51 = vpop.f32.mrf.mxu0 }
 0x1ef PF: > { %s24_s10 = sadd.s32 1, %s1079_s10  }
 0x1f0   : > { %p21_p1 = scmp.ge.s32.totalorder %s24_s10, 13  }
 0x1f2   :  { %23 = sbr.rel (!%p21_p1) target bundleno = 16 (0x10), region = 96 }

</bundles_post_ra>
